<compile_context>
chip_gen: v6e
topology: v6e:2x2x1
jax: 0.10.0
libtpu: 0.0.40
codegen_flags: <defaults>
</compile_context>

<pallas_src>
import functools

import jax
import jax.numpy as jnp
from jax.experimental import pallas as pl
from jax.experimental.pallas import tpu as pltpu

EPS = 1e-5      # torch.nn.LayerNorm default eps
LANE = 128      # TPU lane width

# dot_general dimension numbers: contract over dim 0 of LHS (transposed-LHS matmul)
TN_DIMS = (((0,), (0,)), ((), ()))


def _round_up(x, m):
    return ((x + m - 1) // m) * m


# --------------------------------- the kernel ---------------------------------
def hypergraph_kernel(
    nlayer,
    # packed inputs
    x_ref,        # (N, nfeat)   f32
    y_ref,        # (M, nedge)   f32
    h_ref,        # (N, M)       matmul dtype : un-normalized 0/1 incidence (exact in bf16)
    inv_de_ref,   # (M, 1)       f32          : 1 / hyperedge degree
    inv_dv_ref,   # (N, 1)       f32          : 1 / vertex degree
    vin_w1_ref,   # (nfeat, h)   matmul dtype : LN-affine-folded vertex_input W1
    ein_w1_ref,   # (nedge, h)   matmul dtype : LN-affine-folded edge_input W1
    w_sq_ref,     # (3, h, h)    matmul dtype : [vin_w2, ein_w2, vo_w1']
    w_layer_ref,  # (2L, 2h, h)  matmul dtype : per layer [W_edge_fused, W_vertex_merge]
    vec_ref,      # (5+6L, h)    f32          : all biases / per-layer LN affine rows
    w_out_ref,    # (h, P)       matmul dtype : vo_w2 zero-padded to P lanes
    b_out_ref,    # (1, P)       f32          : vo_b2 zero-padded (kept f32 -> no rounding)
    # output
    out_ref,      # (N, P)       f32
):
    f32 = jnp.float32
    md = w_sq_ref.dtype            # MXU operand dtype (bf16 perf config, f32 supported)
    h = w_sq_ref.shape[1]

    def dot(a, b):                 # cast at MXU boundary only; accumulate in f32
        return jnp.dot(a.astype(md), b.astype(md), preferred_element_type=f32)

    def dot_t(a, b):               # a^T @ b without storing a second (transposed) copy of a
        return jax.lax.dot_general(a.astype(md), b.astype(md), TN_DIMS,
                                   preferred_element_type=f32)

    def norm(x):                   # LayerNorm statistics always in f32
        mu = jnp.mean(x, axis=-1, keepdims=True)
        var = jnp.mean((x - mu) ** 2, axis=-1, keepdims=True)
        return (x - mu) * jax.lax.rsqrt(var + EPS)

    relu = lambda t: jnp.maximum(t, 0.0)

    vec = vec_ref[...]
    v = lambda i: vec[i:i + 1, :]  # static (1, h) parameter row

    H = h_ref[...]                 # (N, M) 0/1
    inv_de = inv_de_ref[...]       # (M, 1) f32
    inv_dv = inv_dv_ref[...]       # (N, 1) f32

    # vertex_input: LN -> Linear -> ReLU -> Dropout(id) -> Linear  (LN affine folded into W1)
    X = norm(x_ref[...].astype(f32))
    X = relu(dot(X, vin_w1_ref[...]) + v(0))
    X = dot(X, w_sq_ref[0]) + v(1)

    # edge_input
    Y = norm(y_ref[...].astype(f32))
    Y = relu(dot(Y, ein_w1_ref[...]) + v(2))
    Y = dot(Y, w_sq_ref[1]) + v(3)

    # UniEGNNConv layers, statically unrolled.  After host-side fusion each layer is:
    #   agg_x = (H^T @ X) * D_e^-1                   (v2e mean, transposed-LHS MXU dot + VPU scale)
    #   Ye    = Y @ A + agg_x @ B + c                (edge_merge∘theta_edge, theta_vertex folded)
    #   agg_y = (H @ Ye) * D_v^-1                    (e2v mean)
    #   Xm    = X @ Wa + agg_y @ Wb + b              (vertex_merge, no activation concat)
    #   X, Y  = relu(LN_v(Xm)), relu(LN_e(Ye))       (dropout = identity at inference)
    for l in range(nlayer):
        o = 5 + 6 * l
        w_em = w_layer_ref[2 * l]                       # (2h, h) fused edge weights
        w_vm = w_layer_ref[2 * l + 1]                   # (2h, h) vertex_merge weights
        agg_x = dot_t(H, X) * inv_de                    # (M, h)
        Ye = dot(Y, w_em[:h, :]) + dot(agg_x, w_em[h:, :]) + v(o + 0)
        agg_y = dot(H, Ye) * inv_dv                     # (N, h)
        Xm = dot(X, w_vm[:h, :]) + dot(agg_y, w_vm[h:, :]) + v(o + 1)
        X = relu(norm(Xm) * v(o + 2) + v(o + 3))
        Y = relu(norm(Ye) * v(o + 4) + v(o + 5))

    # final activation + vertex_out  (its LN affine folded into vo_w1'; output bias in f32)
    X = relu(X)
    X = norm(X)
    X = relu(dot(X, w_sq_ref[2]) + v(4))
    out_ref[...] = dot(X, w_out_ref[...]) + b_out_ref[...]


# -------------------------------- host wrapper ---------------------------------
def hypergraph_model(packed, nlayer, n_vertices, nout):
    out_pad = _round_up(max(nout, 1), LANE)     # lane-dense output -> unmasked stores
    kernel = functools.partial(hypergraph_kernel, nlayer)
    vmem = pl.BlockSpec(memory_space=pltpu.MemorySpace.VMEM)

    # Scoped VMEM limit sized from the actual resident set (single-buffered, gridless call),
    # clamped to the v7x physical capacity so the same config is safe on all generations.
    in_bytes = sum(int(a.size) * jnp.dtype(a.dtype).itemsize for a in packed)
    out_bytes = n_vertices * out_pad * 4
    vmem_limit = int(min(64 << 20, max(32 << 20, 2 * (in_bytes + out_bytes) + (4 << 20))))

    out = pl.pallas_call(
        kernel,
        out_shape=jax.ShapeDtypeStruct((n_vertices, out_pad), jnp.float32),
        in_specs=[vmem] * len(packed),
        out_specs=vmem,
        compiler_params=pltpu.CompilerParams(vmem_limit_bytes=vmem_limit),
    )(*packed)
    # TODO(synk): for graphs where bf16 H (~N*M*2 bytes) + activations exceed ~48 MiB
    # (v7x budget), switch to a vertex-row-tiled grid marked "parallel" (second v7x
    # TensorCore) with H streamed in row tiles and a VMEM accumulator scratch; on v7x an
    # fp8(e4m3) H (0/1 exact) halves the footprint again if mixed-dtype MXU dots allow it.
    return jnp.squeeze(out[:, :nout])           # X.squeeze()


# -------------------- host-side fusion / packing of parameters --------------------
def pack_params(inputs, nlayer, nout, matmul_dtype=jnp.bfloat16,
                precision=jax.lax.Precision.HIGHEST):
    (X_in, Y_in, H, Ht, inv_de, inv_dv,
     vin_lg, vin_lb, vin_w1, vin_b1, vin_w2, vin_b2,
     ein_lg, ein_lb, ein_w1, ein_b1, ein_w2, ein_b2,
     wv, bv, we, be, wem_a, wem_b, bem, wvm_a, wvm_b, bvm,
     lnv_g, lnv_b, lne_g, lne_b,
     vo_lg, vo_lb, vo_w1, vo_b1, vo_w2, vo_b2) = inputs

    mm = lambda a, b: jnp.dot(a, b, precision=precision)
    h = vin_w2.shape[0]
    L = nlayer

    # The theta_vertex-bias pass-through fusion below requires mean aggregation over
    # non-empty hyperedges; fail loudly on graphs that violate it.
    assert bool(jnp.all(jnp.sum(H, axis=0) >= 1.0)), \
        "pack_params fusion requires every hyperedge to have degree >= 1"

    # (1) keep a SINGLE un-normalized 0/1 incidence matrix (exact in bf16); degree
    #     normalizations stay as f32 per-row scales applied after the aggregation matmuls.
    inv_de = inv_de.astype(jnp.float32)     # (M, 1)
    inv_dv = inv_dv.astype(jnp.float32)     # (N, 1)

    # (2) fold the LayerNorm affine of vertex_input / edge_input / vertex_out into the
    #     Linear that immediately follows it: (xhat*g + b) @ W + c = xhat @ (g^T*W) + (b@W + c)
    def fold_ln(g, b, w, bias):
        return g.reshape(-1, 1) * w, mm(b, w) + bias

    vin_w1p, vin_b1p = fold_ln(vin_lg, vin_lb, vin_w1, vin_b1)
    ein_w1p, ein_b1p = fold_ln(ein_lg, ein_lb, ein_w1, ein_b1)
    vo_w1p, vo_b1p = fold_ln(vo_lg, vo_lb, vo_w1, vo_b1)

    # (3) per-layer fusion: fold theta_vertex and theta_edge into edge_merge.
    #     Ye = Y0 @ (wem_a@we) + ((Ht@X)*inv_de) @ (wv@wem_b@we) + ((bem + bv@wem_b)@we + be)
    #     (mean aggregation with non-empty hyperedges passes the theta_vertex bias through)
    A, B, c = [], [], []
    for l in range(L):
        A.append(mm(wem_a[l], we[l]))
        B.append(mm(mm(wv[l], wem_b[l]), we[l]))
        c.append(mm(bem[l] + mm(bv[l], wem_b[l]), we[l]) + be[l])
    A, B, c = jnp.stack(A), jnp.stack(B), jnp.stack(c)        # (L,h,h),(L,h,h),(L,1,h)

    # (4) stack the two K=h halves per matmul and all layers into one slab; the kernel
    #     slices the halves (no activation concat).
    W_em = jnp.concatenate([A, B], axis=1)                    # (L, 2h, h)
    W_vm = jnp.concatenate([wvm_a, wvm_b], axis=1)            # (L, 2h, h)
    w_layer = jnp.stack([W_em, W_vm], axis=1).reshape(2 * L, 2 * h, h)

    w_sq = jnp.stack([vin_w2, ein_w2, vo_w1p], axis=0)        # (3, h, h)

    # (5) pack every (1, h) bias / LN-affine row into one f32 slab
    rows = [vin_b1p, vin_b2, ein_b1p, ein_b2, vo_b1p]
    for l in range(L):
        rows += [c[l], bvm[l], lnv_g[l], lnv_b[l], lne_g[l], lne_b[l]]
    vec = jnp.concatenate(rows, axis=0).astype(jnp.float32)   # (5 + 6L, h)

    # (6) output projection padded to a full lane slab; bias kept separate in f32
    out_pad = _round_up(max(nout, 1), LANE)
    w_out = jnp.zeros((h, out_pad), jnp.float32).at[:, :nout].set(vo_w2)
    b_out = jnp.zeros((1, out_pad), jnp.float32).at[:, :nout].set(vo_b2)

    md = matmul_dtype
    return [X_in.astype(jnp.float32), Y_in.astype(jnp.float32),
            H.astype(md), inv_de, inv_dv,
            vin_w1p.astype(md), ein_w1p.astype(md),
            w_sq.astype(md), w_layer.astype(md), vec,
            w_out.astype(md), b_out]


# -------------------- pure-JAX references (for correctness checks) --------------------
def reference(inputs, nlayer, precision=None):
    """Original, unfused HyperGraphModel math (PyTorch inference semantics)."""
    (X_in, Y_in, H, Ht, inv_de, inv_dv,
     vin_lg, vin_lb, vin_w1, vin_b1, vin_w2, vin_b2,
     ein_lg, ein_lb, ein_w1, ein_b1, ein_w2, ein_b2,
     wv, bv, we, be, wem_a, wem_b, bem, wvm_a, wvm_b, bvm,
     lnv_g, lnv_b, lne_g, lne_b,
     vo_lg, vo_lb, vo_w1, vo_b1, vo_w2, vo_b2) = inputs

    mm = lambda a, b: jnp.dot(a, b, precision=precision)

    def ln(x, g, b):
        mu = jnp.mean(x, axis=-1, keepdims=True)
        var = jnp.mean((x - mu) ** 2, axis=-1, keepdims=True)
        return (x - mu) / jnp.sqrt(var + EPS) * g + b

    relu = lambda t: jnp.maximum(t, 0.0)

    X = ln(X_in, vin_lg, vin_lb)
    X = relu(mm(X, vin_w1) + vin_b1)
    X = mm(X, vin_w2) + vin_b2
    Y = ln(Y_in, ein_lg, ein_lb)
    Y = relu(mm(Y, ein_w1) + ein_b1)
    Y = mm(Y, ein_w2) + ein_b2
    for l in range(nlayer):
        X0, Y0 = X, Y
        Xv = mm(X, wv[l]) + bv[l]
        agg_e = mm(Ht, Xv) * inv_de
        Yc = mm(Y0, wem_a[l]) + mm(agg_e, wem_b[l]) + bem[l]
        Ye = mm(Yc, we[l]) + be[l]
        agg_v = mm(H, Ye) * inv_dv
        Xm = mm(X0, wvm_a[l]) + mm(agg_v, wvm_b[l]) + bvm[l]
        X = relu(ln(Xm, lnv_g[l], lnv_b[l]))
        Y = relu(ln(Ye, lne_g[l], lne_b[l]))
    X = relu(X)
    X = ln(X, vo_lg, vo_lb)
    X = relu(mm(X, vo_w1) + vo_b1)
    out = mm(X, vo_w2) + vo_b2
    return jnp.squeeze(out)


def packed_reference(packed, nlayer, nout, precision=None):
    """Pure-JAX mirror of the fused/packed kernel math (any matmul dtype)."""
    (X_in, Y_in, H, inv_de, inv_dv, vin_w1, ein_w1,
     w_sq, w_layer, vec, w_out, b_out) = packed
    f32 = jnp.float32
    md = w_sq.dtype
    h = w_sq.shape[1]

    dot = lambda a, b: jnp.dot(a.astype(md), b.astype(md),
                               preferred_element_type=f32, precision=precision)
    dot_t = lambda a, b: jax.lax.dot_general(a.astype(md), b.astype(md), TN_DIMS,
                                             preferred_element_type=f32, precision=precision)

    def norm(x):
        mu = jnp.mean(x, axis=-1, keepdims=True)
        var = jnp.mean((x - mu) ** 2, axis=-1, keepdims=True)
        return (x - mu) * jax.lax.rsqrt(var + EPS)

    relu = lambda t: jnp.maximum(t, 0.0)
    v = lambda i: vec[i:i + 1, :]

    X = norm(X_in.astype(f32))
    X = relu(dot(X, vin_w1) + v(0))
    X = dot(X, w_sq[0]) + v(1)
    Y = norm(Y_in.astype(f32))
    Y = relu(dot(Y, ein_w1) + v(2))
    Y = dot(Y, w_sq[1]) + v(3)
    for l in range(nlayer):
        o = 5 + 6 * l
        w_em, w_vm = w_layer[2 * l], w_layer[2 * l + 1]
        agg_x = dot_t(H, X) * inv_de
        Ye = dot(Y, w_em[:h]) + dot(agg_x, w_em[h:]) + v(o + 0)
        agg_y = dot(H, Ye) * inv_dv
        Xm = dot(X, w_vm[:h]) + dot(agg_y, w_vm[h:]) + v(o + 1)
        X = relu(norm(Xm) * v(o + 2) + v(o + 3))
        Y = relu(norm(Ye) * v(o + 4) + v(o + 5))
    X = relu(X)
    X = norm(X)
    X = relu(dot(X, w_sq[2]) + v(4))
    out = dot(X, w_out) + b_out
    return jnp.squeeze(out[:, :nout])


# ------------------------------ param / data init -------------------------------
def build_inputs(key, *, n_vertices, n_edges, nfeat, nedge, nhid, nout, nlayer):
    ks = iter(jax.random.split(key, 64))
    f32 = jnp.float32

    def W(shape, scale=0.1):
        return (scale * jax.random.normal(next(ks), shape)).astype(f32)

    def bias(shape):
        return (0.01 * jax.random.normal(next(ks), shape)).astype(f32)

    def ln_gamma(shape):
        return (1.0 + 0.05 * jax.random.normal(next(ks), shape)).astype(f32)

    def ln_beta(shape):
        return (0.05 * jax.random.normal(next(ks), shape)).astype(f32)

    # features
    X = jax.random.normal(next(ks), (n_vertices, nfeat)).astype(f32)
    Y = jax.random.normal(next(ks), (n_edges, nedge)).astype(f32)

    # deterministic hypergraph incidence H[v, e] in {0,1}; every edge has degree >= 1
    vi = jnp.arange(n_vertices)[:, None]
    ei = jnp.arange(n_edges)[None, :]
    H = (((vi + 2 * ei) % 3 == 0) | ((vi % n_edges) == ei)).astype(f32)
    Ht = H.T
    deg_e = jnp.maximum(jnp.sum(H, axis=0, keepdims=True).T, 1.0)  # (M, 1)
    deg_v = jnp.maximum(jnp.sum(H, axis=1, keepdims=True), 1.0)    # (N, 1)
    inv_de = (1.0 / deg_e).astype(f32)
    inv_dv = (1.0 / deg_v).astype(f32)

    # vertex_input
    vin = [ln_gamma((1, nfeat)), ln_beta((1, nfeat)),
           W((nfeat, nhid)), bias((1, nhid)),
           W((nhid, nhid)), bias((1, nhid))]
    # edge_input
    ein = [ln_gamma((1, nedge)), ln_beta((1, nedge)),
           W((nedge, nhid)), bias((1, nhid)),
           W((nhid, nhid)), bias((1, nhid))]
    # per-layer conv params, stacked along nlayer
    L = nlayer
    conv = [
        W((L, nhid, nhid)), bias((L, 1, nhid)),                       # theta_vertex
        W((L, nhid, nhid)), bias((L, 1, nhid)),                       # theta_edge
        W((L, nhid, nhid)), W((L, nhid, nhid)), bias((L, 1, nhid)),   # edge_merge (split 2h -> h)
        W((L, nhid, nhid)), W((L, nhid, nhid)), bias((L, 1, nhid)),   # vertex_merge (split)
        ln_gamma((L, 1, nhid)), ln_beta((L, 1, nhid)),                # layer_norm_v
        ln_gamma((L, 1, nhid)), ln_beta((L, 1, nhid)),                # layer_norm_e
    ]
    # vertex_out
    vout = [ln_gamma((1, nhid)), ln_beta((1, nhid)),
            W((nhid, nhid)), bias((1, nhid)),
            W((nhid, nout)), bias((1, nout))]

    return [X, Y, H, Ht, inv_de, inv_dv] + vin + ein + conv + vout


# ------------------------------------- main --------------------------------------
if __name__ == "__main__":
    N_VERT, N_EDGE = 16, 8
    NFEAT, NEDGE, NHID, NOUT, NLAYER = 16, 12, 32, 1, 2
    # NOTE: with NHID=32 every GEMM fills only 32 of the 256 MXU columns on v6e/v7x
    # (32/128 on v5e), so the kernel is bandwidth/overhead-bound; at these toy sizes it is
    # purely launch-overhead-bound and perf must be judged at production N/M via xprof.

    key = jax.random.PRNGKey(0)
    inputs = build_inputs(
        key, n_vertices=N_VERT, n_edges=N_EDGE,
        nfeat=NFEAT, nedge=NEDGE, nhid=NHID, nout=NOUT, nlayer=NLAYER)

    HI = jax.lax.Precision.HIGHEST

    # check 1: host-side algebraic fusions vs. the original unfused math (pure JAX, full f32)
    packed_f32 = pack_params(inputs, NLAYER, NOUT, matmul_dtype=jnp.float32, precision=HI)
    ref_unfused = reference(inputs, NLAYER, precision=HI)
    ref_fused = packed_reference(packed_f32, NLAYER, NOUT, precision=HI)
    assert ref_unfused.shape == ref_fused.shape == (N_VERT,), (ref_unfused.shape, ref_fused.shape)
    assert jnp.allclose(ref_fused, ref_unfused, atol=1e-4, rtol=1e-4)

    # check 2: Pallas kernel with f32 MXU operands vs. the same fused math in pure JAX
    out_f32 = jax.block_until_ready(hypergraph_model(packed_f32, NLAYER, N_VERT, NOUT))
    assert out_f32.shape == (N_VERT,), out_f32.shape
    assert jnp.allclose(out_f32, packed_reference(packed_f32, NLAYER, NOUT, precision=HI),
                        atol=1e-4, rtol=1e-4)

    # check 3: Pallas kernel with bf16 MXU operands (perf config on v5e/v6e/v7x alike;
    # 0/1 H and f32 normalization scales make bf16 exact for the aggregation structure)
    packed_bf16 = pack_params(inputs, NLAYER, NOUT, matmul_dtype=jnp.bfloat16, precision=HI)
    out_bf16 = jax.block_until_ready(hypergraph_model(packed_bf16, NLAYER, N_VERT, NOUT))
    assert out_bf16.shape == (N_VERT,), out_bf16.shape
    assert jnp.allclose(out_bf16, packed_reference(packed_bf16, NLAYER, NOUT, precision=HI),
                        atol=2e-3, rtol=2e-3)

    # TODO(synk): dropout layers are treated as identity (inference mode); training-mode
    # stochastic dropout would use pltpu.prng_seed / pltpu.stateful_bernoulli.
    print("KERNEL_OK")
</pallas_src>

<mosaic_0001>
module attributes {stable_mosaic.version = 11 : i64} {
  func.func @hypergraph_kernel(%arg0: memref<16x16xf32, #tpu.memory_space<vmem>>, %arg1: memref<8x12xf32, #tpu.memory_space<vmem>>, %arg2: memref<16x8xf32, #tpu.memory_space<vmem>>, %arg3: memref<8x1xf32, #tpu.memory_space<vmem>>, %arg4: memref<16x1xf32, #tpu.memory_space<vmem>>, %arg5: memref<16x32xf32, #tpu.memory_space<vmem>>, %arg6: memref<12x32xf32, #tpu.memory_space<vmem>>, %arg7: memref<3x32x32xf32, #tpu.memory_space<vmem>>, %arg8: memref<4x64x32xf32, #tpu.memory_space<vmem>>, %arg9: memref<17x32xf32, #tpu.memory_space<vmem>>, %arg10: memref<32x128xf32, #tpu.memory_space<vmem>>, %arg11: memref<1x128xf32, #tpu.memory_space<vmem>>, %arg12: memref<16x128xf32, #tpu.memory_space<vmem>>) attributes {dimension_semantics = [], scalar_prefetch = 0 : i64, scratch_operands = 0 : i64, tpu.core_type = #tpu.core_type<tc>} {
    %c0 = arith.constant 0 : index
    %c0_0 = arith.constant 0 : index
    %0 = vector.load %arg9[%c0, %c0_0] : memref<17x32xf32, #tpu.memory_space<vmem>>, vector<17x32xf32>
    %c0_1 = arith.constant 0 : index
    %c0_2 = arith.constant 0 : index
    %1 = vector.load %arg2[%c0_1, %c0_2] : memref<16x8xf32, #tpu.memory_space<vmem>>, vector<16x8xf32>
    %c0_3 = arith.constant 0 : index
    %c0_4 = arith.constant 0 : index
    %2 = vector.load %arg3[%c0_3, %c0_4] : memref<8x1xf32, #tpu.memory_space<vmem>>, vector<8x1xf32>
    %c0_5 = arith.constant 0 : index
    %c0_6 = arith.constant 0 : index
    %3 = vector.load %arg4[%c0_5, %c0_6] : memref<16x1xf32, #tpu.memory_space<vmem>>, vector<16x1xf32>
    %c0_7 = arith.constant 0 : index
    %c0_8 = arith.constant 0 : index
    %4 = vector.load %arg0[%c0_7, %c0_8] : memref<16x16xf32, #tpu.memory_space<vmem>>, vector<16x16xf32>
    %cst = arith.constant dense<0.000000e+00> : vector<16xf32>
    %5 = vector.multi_reduction <add>, %4, %cst [1] : vector<16x16xf32> to vector<16xf32>
    %6 = vector.shape_cast %5 : vector<16xf32> to vector<16x1xf32>
    %cst_9 = arith.constant 1.600000e+01 : f32
    %7 = vector.broadcast %cst_9 : f32 to vector<16x1xf32>
    %8 = arith.divf %6, %7 : vector<16x1xf32>
    %9 = vector.broadcast %8 : vector<16x1xf32> to vector<16x16xf32>
    %10 = arith.subf %4, %9 : vector<16x16xf32>
    %11 = arith.mulf %10, %10 : vector<16x16xf32>
    %cst_10 = arith.constant dense<0.000000e+00> : vector<16xf32>
    %12 = vector.multi_reduction <add>, %11, %cst_10 [1] : vector<16x16xf32> to vector<16xf32>
    %13 = vector.shape_cast %12 : vector<16xf32> to vector<16x1xf32>
    %cst_11 = arith.constant 1.600000e+01 : f32
    %14 = vector.broadcast %cst_11 : f32 to vector<16x1xf32>
    %15 = arith.divf %13, %14 : vector<16x1xf32>
    %16 = vector.broadcast %8 : vector<16x1xf32> to vector<16x16xf32>
    %17 = arith.subf %4, %16 : vector<16x16xf32>
    %cst_12 = arith.constant 9.99999974E-6 : f32
    %18 = vector.broadcast %cst_12 : f32 to vector<16x1xf32>
    %19 = arith.addf %15, %18 : vector<16x1xf32>
    %20 = math.rsqrt %19 : vector<16x1xf32>
    %21 = vector.broadcast %20 : vector<16x1xf32> to vector<16x16xf32>
    %22 = arith.mulf %17, %21 : vector<16x16xf32>
    %c0_13 = arith.constant 0 : index
    %c0_14 = arith.constant 0 : index
    %23 = vector.load %arg5[%c0_13, %c0_14] : memref<16x32xf32, #tpu.memory_space<vmem>>, vector<16x32xf32>
    %cst_15 = arith.constant dense<0.000000e+00> : vector<16x32xf32>
    %24 = tpu.matmul %22, %23, %cst_15 {dimension_numbers = #tpu.dot_dimension_numbers<[1], [0], [0], [1], [0, 0, 1, 1], [], []>} : vector<16x16xf32>, vector<16x32xf32>, vector<16x32xf32> -> vector<16x32xf32>
    %25 = vector.extract_strided_slice %0 {offsets = [0, 0], sizes = [1, 32], strides = [1, 1]} : vector<17x32xf32> to vector<1x32xf32>
    %26 = vector.broadcast %25 : vector<1x32xf32> to vector<16x32xf32>
    %27 = arith.addf %24, %26 : vector<16x32xf32>
    %cst_16 = arith.constant 0.000000e+00 : f32
    %28 = vector.broadcast %cst_16 : f32 to vector<16x32xf32>
    %29 = arith.maximumf %27, %28 : vector<16x32xf32>
    %c0_17 = arith.constant 0 : index
    %c0_18 = arith.constant 0 : index
    %c0_19 = arith.constant 0 : index
    %30 = vector.load %arg7[%c0_17, %c0_18, %c0_19] : memref<3x32x32xf32, #tpu.memory_space<vmem>>, vector<1x32x32xf32>
    %31 = vector.shape_cast %30 : vector<1x32x32xf32> to vector<32x32xf32>
    %cst_20 = arith.constant dense<0.000000e+00> : vector<16x32xf32>
    %32 = tpu.matmul %29, %31, %cst_20 {dimension_numbers = #tpu.dot_dimension_numbers<[1], [0], [0], [1], [0, 0, 1, 1], [], []>} : vector<16x32xf32>, vector<32x32xf32>, vector<16x32xf32> -> vector<16x32xf32>
    %33 = vector.extract_strided_slice %0 {offsets = [1, 0], sizes = [1, 32], strides = [1, 1]} : vector<17x32xf32> to vector<1x32xf32>
    %34 = vector.broadcast %33 : vector<1x32xf32> to vector<16x32xf32>
    %35 = arith.addf %32, %34 : vector<16x32xf32>
    %c0_21 = arith.constant 0 : index
    %c0_22 = arith.constant 0 : index
    %36 = vector.load %arg1[%c0_21, %c0_22] : memref<8x12xf32, #tpu.memory_space<vmem>>, vector<8x12xf32>
    %cst_23 = arith.constant dense<0.000000e+00> : vector<8xf32>
    %37 = vector.multi_reduction <add>, %36, %cst_23 [1] : vector<8x12xf32> to vector<8xf32>
    %38 = vector.shape_cast %37 : vector<8xf32> to vector<8x1xf32>
    %cst_24 = arith.constant 1.200000e+01 : f32
    %39 = vector.broadcast %cst_24 : f32 to vector<8x1xf32>
    %40 = arith.divf %38, %39 : vector<8x1xf32>
    %41 = vector.broadcast %40 : vector<8x1xf32> to vector<8x12xf32>
    %42 = arith.subf %36, %41 : vector<8x12xf32>
    %43 = arith.mulf %42, %42 : vector<8x12xf32>
    %cst_25 = arith.constant dense<0.000000e+00> : vector<8xf32>
    %44 = vector.multi_reduction <add>, %43, %cst_25 [1] : vector<8x12xf32> to vector<8xf32>
    %45 = vector.shape_cast %44 : vector<8xf32> to vector<8x1xf32>
    %cst_26 = arith.constant 1.200000e+01 : f32
    %46 = vector.broadcast %cst_26 : f32 to vector<8x1xf32>
    %47 = arith.divf %45, %46 : vector<8x1xf32>
    %48 = vector.broadcast %40 : vector<8x1xf32> to vector<8x12xf32>
    %49 = arith.subf %36, %48 : vector<8x12xf32>
    %cst_27 = arith.constant 9.99999974E-6 : f32
    %50 = vector.broadcast %cst_27 : f32 to vector<8x1xf32>
    %51 = arith.addf %47, %50 : vector<8x1xf32>
    %52 = math.rsqrt %51 : vector<8x1xf32>
    %53 = vector.broadcast %52 : vector<8x1xf32> to vector<8x12xf32>
    %54 = arith.mulf %49, %53 : vector<8x12xf32>
    %c0_28 = arith.constant 0 : index
    %c0_29 = arith.constant 0 : index
    %55 = vector.load %arg6[%c0_28, %c0_29] : memref<12x32xf32, #tpu.memory_space<vmem>>, vector<12x32xf32>
    %cst_30 = arith.constant dense<0.000000e+00> : vector<8x32xf32>
    %56 = tpu.matmul %54, %55, %cst_30 {dimension_numbers = #tpu.dot_dimension_numbers<[1], [0], [0], [1], [0, 0, 1, 1], [], []>} : vector<8x12xf32>, vector<12x32xf32>, vector<8x32xf32> -> vector<8x32xf32>
    %57 = vector.extract_strided_slice %0 {offsets = [2, 0], sizes = [1, 32], strides = [1, 1]} : vector<17x32xf32> to vector<1x32xf32>
    %58 = vector.broadcast %57 : vector<1x32xf32> to vector<8x32xf32>
    %59 = arith.addf %56, %58 : vector<8x32xf32>
    %cst_31 = arith.constant 0.000000e+00 : f32
    %60 = vector.broadcast %cst_31 : f32 to vector<8x32xf32>
    %61 = arith.maximumf %59, %60 : vector<8x32xf32>
    %c1 = arith.constant 1 : index
    %c0_32 = arith.constant 0 : index
    %c0_33 = arith.constant 0 : index
    %62 = vector.load %arg7[%c1, %c0_32, %c0_33] : memref<3x32x32xf32, #tpu.memory_space<vmem>>, vector<1x32x32xf32>
    %63 = vector.shape_cast %62 : vector<1x32x32xf32> to vector<32x32xf32>
    %cst_34 = arith.constant dense<0.000000e+00> : vector<8x32xf32>
    %64 = tpu.matmul %61, %63, %cst_34 {dimension_numbers = #tpu.dot_dimension_numbers<[1], [0], [0], [1], [0, 0, 1, 1], [], []>} : vector<8x32xf32>, vector<32x32xf32>, vector<8x32xf32> -> vector<8x32xf32>
    %65 = vector.extract_strided_slice %0 {offsets = [3, 0], sizes = [1, 32], strides = [1, 1]} : vector<17x32xf32> to vector<1x32xf32>
    %66 = vector.broadcast %65 : vector<1x32xf32> to vector<8x32xf32>
    %67 = arith.addf %64, %66 : vector<8x32xf32>
    %c0_35 = arith.constant 0 : index
    %c0_36 = arith.constant 0 : index
    %c0_37 = arith.constant 0 : index
    %68 = vector.load %arg8[%c0_35, %c0_36, %c0_37] : memref<4x64x32xf32, #tpu.memory_space<vmem>>, vector<1x64x32xf32>
    %69 = vector.shape_cast %68 : vector<1x64x32xf32> to vector<64x32xf32>
    %c1_38 = arith.constant 1 : index
    %c0_39 = arith.constant 0 : index
    %c0_40 = arith.constant 0 : index
    %70 = vector.load %arg8[%c1_38, %c0_39, %c0_40] : memref<4x64x32xf32, #tpu.memory_space<vmem>>, vector<1x64x32xf32>
    %71 = vector.shape_cast %70 : vector<1x64x32xf32> to vector<64x32xf32>
    %cst_41 = arith.constant dense<0.000000e+00> : vector<8x32xf32>
    %72 = tpu.matmul %1, %35, %cst_41 {dimension_numbers = #tpu.dot_dimension_numbers<[0], [0], [1], [1], [0, 1, 1, 1], [], []>} : vector<16x8xf32>, vector<16x32xf32>, vector<8x32xf32> -> vector<8x32xf32>
    %73 = vector.broadcast %2 : vector<8x1xf32> to vector<8x32xf32>
    %74 = arith.mulf %72, %73 : vector<8x32xf32>
    %75 = vector.extract_strided_slice %69 {offsets = [0, 0], sizes = [32, 32], strides = [1, 1]} : vector<64x32xf32> to vector<32x32xf32>
    %cst_42 = arith.constant dense<0.000000e+00> : vector<8x32xf32>
    %76 = tpu.matmul %67, %75, %cst_42 {dimension_numbers = #tpu.dot_dimension_numbers<[1], [0], [0], [1], [0, 0, 1, 1], [], []>} : vector<8x32xf32>, vector<32x32xf32>, vector<8x32xf32> -> vector<8x32xf32>
    %77 = vector.extract_strided_slice %69 {offsets = [32, 0], sizes = [32, 32], strides = [1, 1]} : vector<64x32xf32> to vector<32x32xf32>
    %cst_43 = arith.constant dense<0.000000e+00> : vector<8x32xf32>
    %78 = tpu.matmul %74, %77, %cst_43 {dimension_numbers = #tpu.dot_dimension_numbers<[1], [0], [0], [1], [0, 0, 1, 1], [], []>} : vector<8x32xf32>, vector<32x32xf32>, vector<8x32xf32> -> vector<8x32xf32>
    %79 = arith.addf %76, %78 : vector<8x32xf32>
    %80 = vector.extract_strided_slice %0 {offsets = [5, 0], sizes = [1, 32], strides = [1, 1]} : vector<17x32xf32> to vector<1x32xf32>
    %81 = vector.broadcast %80 : vector<1x32xf32> to vector<8x32xf32>
    %82 = arith.addf %79, %81 : vector<8x32xf32>
    %cst_44 = arith.constant dense<0.000000e+00> : vector<16x32xf32>
    %83 = tpu.matmul %1, %82, %cst_44 {dimension_numbers = #tpu.dot_dimension_numbers<[1], [0], [0], [1], [0, 0, 1, 1], [], []>} : vector<16x8xf32>, vector<8x32xf32>, vector<16x32xf32> -> vector<16x32xf32>
    %84 = vector.broadcast %3 : vector<16x1xf32> to vector<16x32xf32>
    %85 = arith.mulf %83, %84 : vector<16x32xf32>
    %86 = vector.extract_strided_slice %71 {offsets = [0, 0], sizes = [32, 32], strides = [1, 1]} : vector<64x32xf32> to vector<32x32xf32>
    %cst_45 = arith.constant dense<0.000000e+00> : vector<16x32xf32>
    %87 = tpu.matmul %35, %86, %cst_45 {dimension_numbers = #tpu.dot_dimension_numbers<[1], [0], [0], [1], [0, 0, 1, 1], [], []>} : vector<16x32xf32>, vector<32x32xf32>, vector<16x32xf32> -> vector<16x32xf32>
    %88 = vector.extract_strided_slice %71 {offsets = [32, 0], sizes = [32, 32], strides = [1, 1]} : vector<64x32xf32> to vector<32x32xf32>
    %cst_46 = arith.constant dense<0.000000e+00> : vector<16x32xf32>
    %89 = tpu.matmul %85, %88, %cst_46 {dimension_numbers = #tpu.dot_dimension_numbers<[1], [0], [0], [1], [0, 0, 1, 1], [], []>} : vector<16x32xf32>, vector<32x32xf32>, vector<16x32xf32> -> vector<16x32xf32>
    %90 = arith.addf %87, %89 : vector<16x32xf32>
    %91 = vector.extract_strided_slice %0 {offsets = [6, 0], sizes = [1, 32], strides = [1, 1]} : vector<17x32xf32> to vector<1x32xf32>
    %92 = vector.broadcast %91 : vector<1x32xf32> to vector<16x32xf32>
    %93 = arith.addf %90, %92 : vector<16x32xf32>
    %cst_47 = arith.constant dense<0.000000e+00> : vector<16xf32>
    %94 = vector.multi_reduction <add>, %93, %cst_47 [1] : vector<16x32xf32> to vector<16xf32>
    %95 = vector.shape_cast %94 : vector<16xf32> to vector<16x1xf32>
    %cst_48 = arith.constant 3.200000e+01 : f32
    %96 = vector.broadcast %cst_48 : f32 to vector<16x1xf32>
    %97 = arith.divf %95, %96 : vector<16x1xf32>
    %98 = vector.broadcast %97 : vector<16x1xf32> to vector<16x32xf32>
    %99 = arith.subf %93, %98 : vector<16x32xf32>
    %100 = arith.mulf %99, %99 : vector<16x32xf32>
    %cst_49 = arith.constant dense<0.000000e+00> : vector<16xf32>
    %101 = vector.multi_reduction <add>, %100, %cst_49 [1] : vector<16x32xf32> to vector<16xf32>
    %102 = vector.shape_cast %101 : vector<16xf32> to vector<16x1xf32>
    %cst_50 = arith.constant 3.200000e+01 : f32
    %103 = vector.broadcast %cst_50 : f32 to vector<16x1xf32>
    %104 = arith.divf %102, %103 : vector<16x1xf32>
    %105 = vector.broadcast %97 : vector<16x1xf32> to vector<16x32xf32>
    %106 = arith.subf %93, %105 : vector<16x32xf32>
    %cst_51 = arith.constant 9.99999974E-6 : f32
    %107 = vector.broadcast %cst_51 : f32 to vector<16x1xf32>
    %108 = arith.addf %104, %107 : vector<16x1xf32>
    %109 = math.rsqrt %108 : vector<16x1xf32>
    %110 = vector.broadcast %109 : vector<16x1xf32> to vector<16x32xf32>
    %111 = arith.mulf %106, %110 : vector<16x32xf32>
    %112 = vector.extract_strided_slice %0 {offsets = [7, 0], sizes = [1, 32], strides = [1, 1]} : vector<17x32xf32> to vector<1x32xf32>
    %113 = vector.broadcast %112 : vector<1x32xf32> to vector<16x32xf32>
    %114 = arith.mulf %111, %113 : vector<16x32xf32>
    %115 = vector.extract_strided_slice %0 {offsets = [8, 0], sizes = [1, 32], strides = [1, 1]} : vector<17x32xf32> to vector<1x32xf32>
    %116 = vector.broadcast %115 : vector<1x32xf32> to vector<16x32xf32>
    %117 = arith.addf %114, %116 : vector<16x32xf32>
    %cst_52 = arith.constant 0.000000e+00 : f32
    %118 = vector.broadcast %cst_52 : f32 to vector<16x32xf32>
    %119 = arith.maximumf %117, %118 : vector<16x32xf32>
    %cst_53 = arith.constant dense<0.000000e+00> : vector<8xf32>
    %120 = vector.multi_reduction <add>, %82, %cst_53 [1] : vector<8x32xf32> to vector<8xf32>
    %121 = vector.shape_cast %120 : vector<8xf32> to vector<8x1xf32>
    %cst_54 = arith.constant 3.200000e+01 : f32
    %122 = vector.broadcast %cst_54 : f32 to vector<8x1xf32>
    %123 = arith.divf %121, %122 : vector<8x1xf32>
    %124 = vector.broadcast %123 : vector<8x1xf32> to vector<8x32xf32>
    %125 = arith.subf %82, %124 : vector<8x32xf32>
    %126 = arith.mulf %125, %125 : vector<8x32xf32>
    %cst_55 = arith.constant dense<0.000000e+00> : vector<8xf32>
    %127 = vector.multi_reduction <add>, %126, %cst_55 [1] : vector<8x32xf32> to vector<8xf32>
    %128 = vector.shape_cast %127 : vector<8xf32> to vector<8x1xf32>
    %cst_56 = arith.constant 3.200000e+01 : f32
    %129 = vector.broadcast %cst_56 : f32 to vector<8x1xf32>
    %130 = arith.divf %128, %129 : vector<8x1xf32>
    %131 = vector.broadcast %123 : vector<8x1xf32> to vector<8x32xf32>
    %132 = arith.subf %82, %131 : vector<8x32xf32>
    %cst_57 = arith.constant 9.99999974E-6 : f32
    %133 = vector.broadcast %cst_57 : f32 to vector<8x1xf32>
    %134 = arith.addf %130, %133 : vector<8x1xf32>
    %135 = math.rsqrt %134 : vector<8x1xf32>
    %136 = vector.broadcast %135 : vector<8x1xf32> to vector<8x32xf32>
    %137 = arith.mulf %132, %136 : vector<8x32xf32>
    %138 = vector.extract_strided_slice %0 {offsets = [9, 0], sizes = [1, 32], strides = [1, 1]} : vector<17x32xf32> to vector<1x32xf32>
    %139 = vector.broadcast %138 : vector<1x32xf32> to vector<8x32xf32>
    %140 = arith.mulf %137, %139 : vector<8x32xf32>
    %141 = vector.extract_strided_slice %0 {offsets = [10, 0], sizes = [1, 32], strides = [1, 1]} : vector<17x32xf32> to vector<1x32xf32>
    %142 = vector.broadcast %141 : vector<1x32xf32> to vector<8x32xf32>
    %143 = arith.addf %140, %142 : vector<8x32xf32>
    %cst_58 = arith.constant 0.000000e+00 : f32
    %144 = vector.broadcast %cst_58 : f32 to vector<8x32xf32>
    %145 = arith.maximumf %143, %144 : vector<8x32xf32>
    %c2 = arith.constant 2 : index
    %c0_59 = arith.constant 0 : index
    %c0_60 = arith.constant 0 : index
    %146 = vector.load %arg8[%c2, %c0_59, %c0_60] : memref<4x64x32xf32, #tpu.memory_space<vmem>>, vector<1x64x32xf32>
    %147 = vector.shape_cast %146 : vector<1x64x32xf32> to vector<64x32xf32>
    %c3 = arith.constant 3 : index
    %c0_61 = arith.constant 0 : index
    %c0_62 = arith.constant 0 : index
    %148 = vector.load %arg8[%c3, %c0_61, %c0_62] : memref<4x64x32xf32, #tpu.memory_space<vmem>>, vector<1x64x32xf32>
    %149 = vector.shape_cast %148 : vector<1x64x32xf32> to vector<64x32xf32>
    %cst_63 = arith.constant dense<0.000000e+00> : vector<8x32xf32>
    %150 = tpu.matmul %1, %119, %cst_63 {dimension_numbers = #tpu.dot_dimension_numbers<[0], [0], [1], [1], [0, 1, 1, 1], [], []>} : vector<16x8xf32>, vector<16x32xf32>, vector<8x32xf32> -> vector<8x32xf32>
    %151 = vector.broadcast %2 : vector<8x1xf32> to vector<8x32xf32>
    %152 = arith.mulf %150, %151 : vector<8x32xf32>
    %153 = vector.extract_strided_slice %147 {offsets = [0, 0], sizes = [32, 32], strides = [1, 1]} : vector<64x32xf32> to vector<32x32xf32>
    %cst_64 = arith.constant dense<0.000000e+00> : vector<8x32xf32>
    %154 = tpu.matmul %145, %153, %cst_64 {dimension_numbers = #tpu.dot_dimension_numbers<[1], [0], [0], [1], [0, 0, 1, 1], [], []>} : vector<8x32xf32>, vector<32x32xf32>, vector<8x32xf32> -> vector<8x32xf32>
    %155 = vector.extract_strided_slice %147 {offsets = [32, 0], sizes = [32, 32], strides = [1, 1]} : vector<64x32xf32> to vector<32x32xf32>
    %cst_65 = arith.constant dense<0.000000e+00> : vector<8x32xf32>
    %156 = tpu.matmul %152, %155, %cst_65 {dimension_numbers = #tpu.dot_dimension_numbers<[1], [0], [0], [1], [0, 0, 1, 1], [], []>} : vector<8x32xf32>, vector<32x32xf32>, vector<8x32xf32> -> vector<8x32xf32>
    %157 = arith.addf %154, %156 : vector<8x32xf32>
    %158 = vector.extract_strided_slice %0 {offsets = [11, 0], sizes = [1, 32], strides = [1, 1]} : vector<17x32xf32> to vector<1x32xf32>
    %159 = vector.broadcast %158 : vector<1x32xf32> to vector<8x32xf32>
    %160 = arith.addf %157, %159 : vector<8x32xf32>
    %cst_66 = arith.constant dense<0.000000e+00> : vector<16x32xf32>
    %161 = tpu.matmul %1, %160, %cst_66 {dimension_numbers = #tpu.dot_dimension_numbers<[1], [0], [0], [1], [0, 0, 1, 1], [], []>} : vector<16x8xf32>, vector<8x32xf32>, vector<16x32xf32> -> vector<16x32xf32>
    %162 = vector.broadcast %3 : vector<16x1xf32> to vector<16x32xf32>
    %163 = arith.mulf %161, %162 : vector<16x32xf32>
    %164 = vector.extract_strided_slice %149 {offsets = [0, 0], sizes = [32, 32], strides = [1, 1]} : vector<64x32xf32> to vector<32x32xf32>
    %cst_67 = arith.constant dense<0.000000e+00> : vector<16x32xf32>
    %165 = tpu.matmul %119, %164, %cst_67 {dimension_numbers = #tpu.dot_dimension_numbers<[1], [0], [0], [1], [0, 0, 1, 1], [], []>} : vector<16x32xf32>, vector<32x32xf32>, vector<16x32xf32> -> vector<16x32xf32>
    %166 = vector.extract_strided_slice %149 {offsets = [32, 0], sizes = [32, 32], strides = [1, 1]} : vector<64x32xf32> to vector<32x32xf32>
    %cst_68 = arith.constant dense<0.000000e+00> : vector<16x32xf32>
    %167 = tpu.matmul %163, %166, %cst_68 {dimension_numbers = #tpu.dot_dimension_numbers<[1], [0], [0], [1], [0, 0, 1, 1], [], []>} : vector<16x32xf32>, vector<32x32xf32>, vector<16x32xf32> -> vector<16x32xf32>
    %168 = arith.addf %165, %167 : vector<16x32xf32>
    %169 = vector.extract_strided_slice %0 {offsets = [12, 0], sizes = [1, 32], strides = [1, 1]} : vector<17x32xf32> to vector<1x32xf32>
    %170 = vector.broadcast %169 : vector<1x32xf32> to vector<16x32xf32>
    %171 = arith.addf %168, %170 : vector<16x32xf32>
    %cst_69 = arith.constant dense<0.000000e+00> : vector<16xf32>
    %172 = vector.multi_reduction <add>, %171, %cst_69 [1] : vector<16x32xf32> to vector<16xf32>
    %173 = vector.shape_cast %172 : vector<16xf32> to vector<16x1xf32>
    %cst_70 = arith.constant 3.200000e+01 : f32
    %174 = vector.broadcast %cst_70 : f32 to vector<16x1xf32>
    %175 = arith.divf %173, %174 : vector<16x1xf32>
    %176 = vector.broadcast %175 : vector<16x1xf32> to vector<16x32xf32>
    %177 = arith.subf %171, %176 : vector<16x32xf32>
    %178 = arith.mulf %177, %177 : vector<16x32xf32>
    %cst_71 = arith.constant dense<0.000000e+00> : vector<16xf32>
    %179 = vector.multi_reduction <add>, %178, %cst_71 [1] : vector<16x32xf32> to vector<16xf32>
    %180 = vector.shape_cast %179 : vector<16xf32> to vector<16x1xf32>
    %cst_72 = arith.constant 3.200000e+01 : f32
    %181 = vector.broadcast %cst_72 : f32 to vector<16x1xf32>
    %182 = arith.divf %180, %181 : vector<16x1xf32>
    %183 = vector.broadcast %175 : vector<16x1xf32> to vector<16x32xf32>
    %184 = arith.subf %171, %183 : vector<16x32xf32>
    %cst_73 = arith.constant 9.99999974E-6 : f32
    %185 = vector.broadcast %cst_73 : f32 to vector<16x1xf32>
    %186 = arith.addf %182, %185 : vector<16x1xf32>
    %187 = math.rsqrt %186 : vector<16x1xf32>
    %188 = vector.broadcast %187 : vector<16x1xf32> to vector<16x32xf32>
    %189 = arith.mulf %184, %188 : vector<16x32xf32>
    %190 = vector.extract_strided_slice %0 {offsets = [13, 0], sizes = [1, 32], strides = [1, 1]} : vector<17x32xf32> to vector<1x32xf32>
    %191 = vector.broadcast %190 : vector<1x32xf32> to vector<16x32xf32>
    %192 = arith.mulf %189, %191 : vector<16x32xf32>
    %193 = vector.extract_strided_slice %0 {offsets = [14, 0], sizes = [1, 32], strides = [1, 1]} : vector<17x32xf32> to vector<1x32xf32>
    %194 = vector.broadcast %193 : vector<1x32xf32> to vector<16x32xf32>
    %195 = arith.addf %192, %194 : vector<16x32xf32>
    %cst_74 = arith.constant 0.000000e+00 : f32
    %196 = vector.broadcast %cst_74 : f32 to vector<16x32xf32>
    %197 = arith.maximumf %195, %196 : vector<16x32xf32>
    %cst_75 = arith.constant 0.000000e+00 : f32
    %198 = vector.broadcast %cst_75 : f32 to vector<16x32xf32>
    %199 = arith.maximumf %197, %198 : vector<16x32xf32>
    %cst_76 = arith.constant dense<0.000000e+00> : vector<16xf32>
    %200 = vector.multi_reduction <add>, %199, %cst_76 [1] : vector<16x32xf32> to vector<16xf32>
    %201 = vector.shape_cast %200 : vector<16xf32> to vector<16x1xf32>
    %cst_77 = arith.constant 3.200000e+01 : f32
    %202 = vector.broadcast %cst_77 : f32 to vector<16x1xf32>
    %203 = arith.divf %201, %202 : vector<16x1xf32>
    %204 = vector.broadcast %203 : vector<16x1xf32> to vector<16x32xf32>
    %205 = arith.subf %199, %204 : vector<16x32xf32>
    %206 = arith.mulf %205, %205 : vector<16x32xf32>
    %cst_78 = arith.constant dense<0.000000e+00> : vector<16xf32>
    %207 = vector.multi_reduction <add>, %206, %cst_78 [1] : vector<16x32xf32> to vector<16xf32>
    %208 = vector.shape_cast %207 : vector<16xf32> to vector<16x1xf32>
    %cst_79 = arith.constant 3.200000e+01 : f32
    %209 = vector.broadcast %cst_79 : f32 to vector<16x1xf32>
    %210 = arith.divf %208, %209 : vector<16x1xf32>
    %211 = vector.broadcast %203 : vector<16x1xf32> to vector<16x32xf32>
    %212 = arith.subf %199, %211 : vector<16x32xf32>
    %cst_80 = arith.constant 9.99999974E-6 : f32
    %213 = vector.broadcast %cst_80 : f32 to vector<16x1xf32>
    %214 = arith.addf %210, %213 : vector<16x1xf32>
    %215 = math.rsqrt %214 : vector<16x1xf32>
    %216 = vector.broadcast %215 : vector<16x1xf32> to vector<16x32xf32>
    %217 = arith.mulf %212, %216 : vector<16x32xf32>
    %c2_81 = arith.constant 2 : index
    %c0_82 = arith.constant 0 : index
    %c0_83 = arith.constant 0 : index
    %218 = vector.load %arg7[%c2_81, %c0_82, %c0_83] : memref<3x32x32xf32, #tpu.memory_space<vmem>>, vector<1x32x32xf32>
    %219 = vector.shape_cast %218 : vector<1x32x32xf32> to vector<32x32xf32>
    %cst_84 = arith.constant dense<0.000000e+00> : vector<16x32xf32>
    %220 = tpu.matmul %217, %219, %cst_84 {dimension_numbers = #tpu.dot_dimension_numbers<[1], [0], [0], [1], [0, 0, 1, 1], [], []>} : vector<16x32xf32>, vector<32x32xf32>, vector<16x32xf32> -> vector<16x32xf32>
    %221 = vector.extract_strided_slice %0 {offsets = [4, 0], sizes = [1, 32], strides = [1, 1]} : vector<17x32xf32> to vector<1x32xf32>
    %222 = vector.broadcast %221 : vector<1x32xf32> to vector<16x32xf32>
    %223 = arith.addf %220, %222 : vector<16x32xf32>
    %cst_85 = arith.constant 0.000000e+00 : f32
    %224 = vector.broadcast %cst_85 : f32 to vector<16x32xf32>
    %225 = arith.maximumf %223, %224 : vector<16x32xf32>
    %c0_86 = arith.constant 0 : index
    %c0_87 = arith.constant 0 : index
    %226 = vector.load %arg10[%c0_86, %c0_87] : memref<32x128xf32, #tpu.memory_space<vmem>>, vector<32x128xf32>
    %cst_88 = arith.constant dense<0.000000e+00> : vector<16x128xf32>
    %227 = tpu.matmul %225, %226, %cst_88 {dimension_numbers = #tpu.dot_dimension_numbers<[1], [0], [0], [1], [0, 0, 1, 1], [], []>} : vector<16x32xf32>, vector<32x128xf32>, vector<16x128xf32> -> vector<16x128xf32>
    %c0_89 = arith.constant 0 : index
    %c0_90 = arith.constant 0 : index
    %228 = vector.load %arg11[%c0_89, %c0_90] : memref<1x128xf32, #tpu.memory_space<vmem>>, vector<1x128xf32>
    %229 = vector.broadcast %228 : vector<1x128xf32> to vector<16x128xf32>
    %230 = arith.addf %227, %229 : vector<16x128xf32>
    %c0_91 = arith.constant 0 : index
    %c0_92 = arith.constant 0 : index
    %231 = vector.load %arg12[%c0_91, %c0_92] : memref<16x128xf32, #tpu.memory_space<vmem>>, vector<16x128xf32>
    tpu.vector_store %arg12[%c0_91, %c0_92], %230 {strides = array<i32>} : memref<16x128xf32, #tpu.memory_space<vmem>>, vector<16x128xf32>,
    return
  }
}

</mosaic_0001>

<bundles_post_ra>
// kernel: tpu_custom_call.1
= control target key start
LH: loop header
LB: loop body
LE: loop exit
PB: predicated region body
PF: predicated region fallthrough
CT: control target
= control target key end

     0   :  { %vm51_vm0 = vcmask 130048   ;;  %s2621_s0 = inlined_call_operand.vmem [shape: f32[16,16], index: 0, kind: input, shape index: {}]   ;;  %s2622_s1 = inlined_call_operand.vmem [shape: f32[8,12], index: 1, kind: input, shape index: {}]   ;;  %s2623_s2 = inlined_call_operand.vmem [shape: f32[16,8], index: 2, kind: input, shape index: {}]   ;;  %s2624_s3 = inlined_call_operand.vmem [shape: f32[8,1], index: 3, kind: input, shape index: {}]   ;;  %s2625_s4 = inlined_call_operand.vmem [shape: f32[16,1], index: 4, kind: input, shape index: {}]   ;;  %s2626_s5 = inlined_call_operand.vmem [shape: f32[16,32], index: 5, kind: input, shape index: {}]   ;;  %s2627_s6 = inlined_call_operand.vmem [shape: f32[12,32], index: 6, kind: input, shape index: {}]   ;;  %s2628_s7 = inlined_call_operand.vmem [shape: f32[3,32,32], index: 7, kind: input, shape index: {}]   ;;  %s2629_s8 = inlined_call_operand.vmem [shape: f32[4,64,32], index: 8, kind: input, shape index: {}]   ;;  %s2630_s9 = inlined_call_operand.vmem [shape: f32[17,32], index: 9, kind: input, shape index: {}]   ;;  %s2631_s10 = inlined_call_operand.vmem [shape: f32[32,128], index: 10, kind: input, shape index: {}]   ;;  %s2632_s11 = inlined_call_operand.vmem [shape: f32[1,128], index: 11, kind: input, shape index: {}]   ;;  %s2633_s12 = inlined_call_operand.hbm [shape: f32[16,128], index: 12, kind: output, shape index: {}]  }
   0x1   :  { %v49_v0 = vld [vmem:[%s2621_s0] sm:$0xff]  ;;  %v50_v1 = vld [vmem:[%s2621_s0 + $0x8] sm:$0xff] }
   0x2   :  { %v52_v2 = vsel %vm51_vm0, %v49_v0, 0.0 }
   0x3   :  { %17 = vsyncpa [#allocation3], 0  ;;  %53 = vadd.xlane.f32.xlu0 %v52_v2  ;;  %v55_v3 = vsel %vm51_vm0, %v50_v1, 0.0  ;;  %v258_v4 = vld [vmem:[%s2622_s1] sm:$0xff]  ;;  %vm259_vm1 = vcmask 97280   ;;  %v80_v21 = vld [vmem:[%s2626_s5 + $0x8] sm:$0xff]  ;;  %v81_v51 = vlaneseq }
   0x4   :  { %v260_v5 = vsel %vm259_vm1, %v258_v4, 0.0  ;;  %1949 = vmatprep.subr.mxu0 %v80_v21  ;;  %v79_v22 = vld [vmem:[%s2626_s5] sm:$0xff]  ;;  %v2169_v23 = vmov 0.0   ;;  %v275_v37 = vld [vmem:[%s2627_s6 + $0x8] sm:$0xf]  ;;  %vm283_vm2 = vcmask 1043456  }
   0x5   :  { %1950 = vmatpush3.msra.mxu0 %v80_v21  ;;  %v274_v38 = vld [vmem:[%s2627_s6] sm:$0xff]  ;;  %vm2170_vm3 = vmmov 0   ;;  %v171_v41 = vld [vmem:[%s2628_s7 + $0x18] sm:$0xff]  ;;  %v170_v42 = vld [vmem:[%s2628_s7 + $0x10] sm:$0xff]  ;;  %v2318_v52 = vshrl.u32 %v81_v51, 7  ;;  %vm176_vm4 = vcmask 261120  }
   0x6   :  { %1951 = vmatprep.subr.mxu0 %v79_v22  ;;  %1956 = vmatprep.subr.mxu1 %v171_v41  ;;  %v169_v43 = vld [vmem:[%s2628_s7 + $0x8] sm:$0xff]  ;;  %v168_v44 = vld [vmem:[%s2628_s7] sm:$0xff]  ;;  %v1810_v45 = vld [vmem:[%s2628_s7 + $0x38] sm:$0xff]  ;;  %vm719_vm5 = vcmask 64512  }
   0x7   :  { %56 = vadd.xlane.f32.xlu0 %v55_v3  ;;  %1952 = vmatpush3.msra.mxu0 %v79_v22  ;;  %v1809_v46 = vld [vmem:[%s2628_s7 + $0x30] sm:$0xff]  ;;  %v2299_v47 = vld [vmem:[%s2623_s2] sm:$0xff]  ;;  %v1808_v48 = vld [vmem:[%s2628_s7 + $0x28] sm:$0xff]  ;;  %v83_v53 = vsub.s32 0, %v2318_v52  ;;  %v278_v55 = vsub.s32 2, %v2318_v52 }
   0x8   :  { %1967 = vmatprep.subr.mxu0 %v2169_v23  ;;  %1957 = vmatpush3.msra.mxu1 %v171_v41  ;;  %v2309_v49 = vld [vmem:[%s2623_s2 + $0x8] sm:$0xff]  ;;  %v1807_v50 = vld [vmem:[%s2628_s7 + $0x20] sm:$0xff] }
   0x9   :  { %1958 = vmatprep.subr.mxu1 %v170_v42  ;;  %v2324_v54 = vld [vmem:[%s2630_s9] sm:$0xff] }
   0xa   :  { %1959 = vmatpush3.msra.mxu1 %v170_v42  ;;  %v84_v56 = vrot.slane %v2324_v54, %v83_v53  ;;  %v279_v58 = vrot.slane %v2324_v54, %v278_v55  ;;  %v1815_v42 = vld [vmem:[%s2629_s8 + $0x58] sm:$0xff] }
   0xb   :  { %261 = vadd.xlane.f32.xlu0 %v260_v5  ;;  %1960 = vmatprep.subr.mxu1 %v169_v43  ;;  %v442_v5 = vld [vmem:[%s2629_s8 + $0x10] sm:$0xff] }
   0xc   :  { %1961 = vmatpush3.msra.mxu1 %v169_v43  ;;  %v1814_v43 = vld [vmem:[%s2629_s8 + $0x50] sm:$0xff] }
   0xd   :  { %1962 = vmatprep.subr.mxu1 %v168_v44 }
   0xe   :  { %1963 = vmatpush3.msra.mxu1 %v168_v44  ;;  %v1813_v44 = vld [vmem:[%s2629_s8 + $0x48] sm:$0xff] }
   0xf   :  { %1985 = vmatprep.subr.mxu1 %v2169_v23 }
  0x38   :  { %457 = vxpose.xlu0.b32.start [1/2] (short) (narrow) %v2299_v47, 8 }
  0x3c   :  { %458 = vxpose.xlu0.b32.end [2/2] (short) (narrow) %v2309_v49, 8 }
  0x8c   :  { %v54_v6 = vpop.xlane.xlu0 %53 }
  0x8d   :  { %v59_v7 = vmul.f32 0.0625, %v54_v6  ;;  %v2171_v6 = vmov 0  }
  0x8e   :  { %2125 = vset.pattern.permute.xlu1 %v2171_v6  ;;  %2126 = vset.pattern.permute.xlu0 %v2171_v6 }
  0x8f   :  { %v61_v8 = vsub.f32 %v49_v0, %v59_v7  ;;  %v46_v7 = vld [vmem:[%s2624_s3] sm:$0xff] }
  0x90   :  { %v57_v9 = vpop.xlane.xlu0 %56 }
  0x91   :  { %v60_v10 = vmul.f32 0.0625, %v57_v9  ;;  %v63_v11 = vmul.f32 %v61_v8, %v61_v8  ;;  %v47_v9 = vld [vmem:[%s2625_s4] sm:$0xff] }
  0x93   :  { %v62_v12 = vsub.f32 %v50_v1, %v60_v10  ;;  %v65_v13 = vsel %vm51_vm0, %v63_v11, 0.0  ;;  %v440_v10 = vld [vmem:[%s2629_s8] sm:$0xff]  ;;  %v48_v11 = vld [vmem:[%s2625_s4 + $0x8] sm:$0xff] }
  0x94   :  { %66 = vadd.xlane.f32.xlu1 %v65_v13  ;;  %v262_v14 = vpop.xlane.xlu0 %261  ;;  %v365_v13 = vsub.s32 3, %v2318_v52 }
  0x95   :  { %v64_v15 = vmul.f32 %v62_v12, %v62_v12  ;;  %v264_v16 = vmul.f32 0.083333336, %v262_v14 }
  0x97   :  { %v68_v17 = vsel %vm51_vm0, %v64_v15, 0.0  ;;  %v265_v18 = vsub.f32 %v258_v4, %v264_v16  ;;  %v443_v4 = vld [vmem:[%s2629_s8 + $0x18] sm:$0xff]  ;;  %v366_v15 = vrot.slane %v2324_v54, %v365_v13 }
  0x98   :  { %69 = vadd.xlane.f32.xlu1 %v68_v17 }
  0x99   :  { %v266_v19 = vmul.f32 %v265_v18, %v265_v18 }
  0x9b   :  { %v267_v20 = vsel %vm259_vm1, %v266_v19, 0.0 }
  0x9c   :  { %268 = vadd.xlane.f32.xlu1 %v267_v20 }
  0xad   :  { %564 = vperm.xlu1 %2125, %v46_v7  }
  0xb1   :  { %803 = vperm.xlu1 %2125, %v47_v9  }
  0xb4   :  { %v2372_v22 = vpop.trf.xlu0 }
  0xb5   :  { %808 = vperm.xlu1 %2125, %v48_v11  }
 0x11d   :  { %v67_v24 = vpop.xlane.xlu1 %66 }
 0x11e   :  { %v71_v25 = vmul.f32 0.0625, %v67_v24 }
 0x120   :  { %v73_v26 = vadd.f32 1e-05, %v71_v25  ;;  %v447_v25 = vld [vmem:[%s2629_s8 + $0x38] sm:$0xff] }
 0x121   :  { %v70_v27 = vpop.xlane.xlu1 %69 }
 0x122   :  { %2127 = vrsqrt.f32 %v73_v26  ;;  %v72_v28 = vmul.f32 0.0625, %v70_v27  ;;  %v446_v26 = vld [vmem:[%s2629_s8 + $0x30] sm:$0xff]  ;;  %v445_v27 = vld [vmem:[%s2629_s8 + $0x28] sm:$0xff] }
 0x124   :  { %v74_v29 = vadd.f32 1e-05, %v72_v28  ;;  %v444_v28 = vld [vmem:[%s2629_s8 + $0x20] sm:$0xff] }
 0x125   :  { %v269_v30 = vpop.xlane.xlu1 %268 }
 0x126   :  { %2129 = vrsqrt.f32 %v74_v29  ;;  %v270_v31 = vmul.f32 0.083333336, %v269_v30 }
 0x128   :  { %v271_v32 = vadd.f32 1e-05, %v270_v31 }
 0x129   :  { %v2396_v30 = vpop.permute.xlu1 %564 }
 0x12a   :  { %2131 = vrsqrt.f32 %v271_v32 }
 0x12d   :  { %v2442_v51 = vpop.permute.xlu1 %803 }
 0x12f   :  { %v2128_v33 = vpop.eup %2127 }
 0x130   :  { %v77_v34 = vmul.f32 %v2128_v33, %v61_v8  ;;  %v441_v8 = vld [vmem:[%s2629_s8 + $0x8] sm:$0xff] }
 0x132   :  { %1953 = vmatprep.mubr.msk.f32.mxu0 %vm51_vm0, %v77_v34 }
 0x133   :  { %v2130_v35 = vpop.eup %2129 }
 0x134   :  { %v78_v36 = vmul.f32 %v2130_v35, %v62_v12  ;;  %v174_v12 = vsub.s32 1, %v2318_v52  ;;  %v1819_v35 = vld [vmem:[%s2629_s8 + $0x78] sm:$0xff] }
 0x136   :  { %1954 = vmatmul.mubr.msk.f32.vlgmr.msra.gmra.mxu0 %vm51_vm0, %v78_v36  ;;  %v175_v14 = vrot.slane %v2324_v54, %v174_v12  ;;  %v716_v36 = vsub.s32 5, %v2318_v52 }
 0x137   :  { %v2132_v39 = vpop.eup %2131  ;;  %1968 = vmatpush3.msk.msra.mxu0 %vm283_vm2, %v275_v37  ;;  %1971 = vmatprep.mubr.msk.f32.mxu0 %vm2170_vm3, %v2169_v23 }
 0x138   :  { %1969 = vmatprep.subr.mxu0 %v2169_v23  ;;  %v273_v40 = vmul.f32 %v2132_v39, %v265_v18  ;;  %v717_v37 = vrot.slane %v2324_v54, %v716_v36 }
 0x139   :  { %1970 = vmatpush3.msra.mxu0 %v274_v38 }
 0x13a   :  { %1972 = vmatmul.mubr.msk.f32.vlgmr.msra.gmra.mxu0 %vm259_vm1, %v273_v40  ;;  %1974 = vmatprep.subr.mxu0 %v2169_v23 }
 0x13b   :  { %1982 = vmatprep.mubr.msk.f32.mxu0 %vm2170_vm3, %v2169_v23  ;;  %1975 = vmatpush3.msra.mxu0 %v1810_v45  ;;  %v1812_v45 = vld [vmem:[%s2629_s8 + $0x40] sm:$0xff] }
 0x13c   :  { %1976 = vmatprep.subr.mxu0 %v2169_v23 }
 0x13d   :  { %1977 = vmatpush3.msra.mxu0 %v1809_v46  ;;  %v1818_v46 = vld [vmem:[%s2629_s8 + $0x70] sm:$0xff] }
 0x13e   :  { %1978 = vmatprep.subr.mxu0 %v2169_v23 }
 0x13f   :  { %1979 = vmatpush3.msra.mxu0 %v1808_v48  ;;  %v1817_v48 = vld [vmem:[%s2629_s8 + $0x68] sm:$0xff] }
 0x140   :  { %1980 = vmatprep.subr.mxu0 %v2169_v23 }
 0x141   :  { %1981 = vmatpush3.msra.mxu0 %v1807_v50  ;;  %v1816_v50 = vld [vmem:[%s2629_s8 + $0x60] sm:$0xff] }
 0x142   :  { %2003 = vmatprep.subr.mxu0 %v2169_v23 }
 0x1f6   :  { %v1955_v57 = vpop.f32.mrf.mxu0 }
 0x1f7   :  { %v163_v59 = vadd.f32 %v1955_v57, %v84_v56 }
 0x1f8   :  { %v157_v60 = vpop.f32.mrf.mxu0 }
 0x1f9   :  { %v158_v61 = vadd.f32 %v157_v60, %v84_v56  ;;  %v167_v1 = vmax.f32 %v163_v59, 0.0 }
 0x1fa   :  { %v353_v62 = vpop.f32.mrf.mxu0 }
 0x1fb   :  { %v166_v63 = vmax.f32 %v158_v61, 0.0  ;;  %v354_v0 = vadd.f32 %v353_v62, %v279_v58  ;;  %v2444_v58 = vpop.permute.xlu1 %808  ;;  %v977_v61 = vsub.s32 6, %v2318_v52 }
 0x1fc   :  { %v1973_v2 = vpop.f32.mrf.mxu0 }
 0x1fd   :  { %1964 = vmatprep.mubr.msk.f32.mxu1 %vm176_vm4, %v166_v63  ;;  %v357_v3 = vmax.f32 %v354_v0, 0.0  ;;  %v978_v63 = vrot.slane %v2324_v54, %v977_v61 }
 0x1fe   :  { %1965 = vmatmul.mubr.msk.f32.vlgmr.msra.gmra.mxu1 %vm176_vm4, %v167_v1 }
 0x1ff   :  { %1983 = vmatmul.mubr.msk.f32.vlgmr.msra.gmra.mxu0 %vm176_vm4, %v357_v3  ;;  %1989 = vmatprep.mubr.msk.f32.mxu1 %vm2170_vm3, %v2169_v23 }
 0x200   :  { %2011 = vmatprep.mubr.msk.f32.mxu0 %vm2170_vm3, %v2169_v23  ;;  %2004 = vmatpush3.msra.mxu0 %v443_v4 }
 0x201   :  { %2005 = vmatprep.subr.mxu0 %v2169_v23 }
 0x202   :  { %2006 = vmatpush3.msra.mxu0 %v442_v5 }
 0x203   :  { %2007 = vmatprep.subr.mxu0 %v2169_v23 }
 0x204   :  { %2008 = vmatpush3.msra.mxu0 %v441_v8 }
 0x205   :  { %2009 = vmatprep.subr.mxu0 %v2169_v23 }
 0x206   :  { %2010 = vmatpush3.msra.mxu0 %v440_v10 }
 0x207   :  { %2019 = vmatprep.subr.mxu0 %v1819_v35 }
 0x2be   :  { %v1966_v16 = vpop.f32.mrf.mxu1 }
 0x2bf   :  { %v255_v17 = vadd.f32 %v1966_v16, %v175_v14  ;;  %v436_v18 = vpop.f32.mrf.mxu0 }
 0x2c0   :  { %v249_v19 = vpop.f32.mrf.mxu1  ;;  %v437_v20 = vadd.f32 %v436_v18, %v366_v15 }
 0x2c1   :  { %v250_v21 = vadd.f32 %v249_v19, %v175_v14  ;;  %1986 = vmatpush3.msra.mxu1 %v255_v17  ;;  %v1984_v24 = vpop.f32.mrf.mxu0 }
 0x2c2   :  { %1987 = vmatprep.subr.mxu1 %v2169_v23  ;;  %2012 = vmatmul.mubr.msk.f32.vlgmr.msra.gmra.mxu0 %vm176_vm4, %v437_v20 }
 0x2c3   :  { %1988 = vmatpush3.msra.mxu1 %v250_v21  ;;  %2020 = vmatpush3.msra.mxu0 %v1819_v35  ;;  %v1010_v35 = vsub.s32 7, %v2318_v52 }
 0x2c4   :  { %1990 = vmatmul.mubr.msk.f32.vlgmr.msra.gmra.mxu1 %vm51_vm0, %v2372_v22  ;;  %1992 = vmatprep.subr.mxu1 %v2169_v23 }
 0x2c5   :  { %1993 = vmatpush3.msra.mxu1 %v447_v25  ;;  %2000 = vmatprep.mubr.msk.f32.mxu1 %vm2170_vm3, %v2169_v23 }
 0x2c6   :  { %1994 = vmatprep.subr.mxu1 %v2169_v23  ;;  %2021 = vmatprep.subr.mxu0 %v1818_v46 }
 0x2c7   :  { %1995 = vmatpush3.msra.mxu1 %v446_v26  ;;  %2022 = vmatpush3.msra.mxu0 %v1818_v46 }
 0x2c8   :  { %1996 = vmatprep.subr.mxu1 %v2169_v23  ;;  %2023 = vmatprep.subr.mxu0 %v1817_v48 }
 0x2c9   :  { %1997 = vmatpush3.msra.mxu1 %v445_v27  ;;  %2024 = vmatpush3.msra.mxu0 %v1817_v48 }
 0x2ca   :  { %1998 = vmatprep.subr.mxu1 %v2169_v23  ;;  %2025 = vmatprep.subr.mxu0 %v1816_v50 }
 0x2cb   :  { %1999 = vmatpush3.msra.mxu1 %v444_v28  ;;  %2026 = vmatpush3.msra.mxu0 %v1816_v50 }
 0x2cc   :  { %2041 = vmatprep.subr.mxu0 %v2169_v23 }
 0x382   :  { %v710_v29 = vpop.f32.mrf.mxu0 }
 0x384   :  { %v558_v31 = vpop.f32.mrf.mxu1  ;;  %v2013_v32 = vpop.f32.mrf.mxu0 }
 0x385   :  { %v567_v33 = vmul.f32 %v2396_v30, %v558_v31 }
 0x386   :  { %v1991_v34 = vpop.f32.mrf.mxu1 }
 0x387   :  { %2001 = vmatmul.mubr.msk.f32.vlgmr.msra.gmra.mxu1 %vm176_vm4, %v567_v33 }
 0x388   :  { %2016 = vmatprep.mubr.msk.f32.mxu1 %vm719_vm5, %v2299_v47 }
 0x447   :  { %v637_v38 = vpop.f32.mrf.mxu1 }
 0x448   :  { %v711_v39 = vadd.f32 %v710_v29, %v637_v38  ;;  %v2468_v38 = vld [vmem:[%s2630_s9 + $0x8] sm:$0xff] }
 0x449   :  { %v2002_v40 = vpop.f32.mrf.mxu1 }
 0x44a   :  { %v2409_v41 = vadd.f32 %v717_v37, %v711_v39  ;;  %v1011_v39 = vrot.slane %v2324_v54, %v1010_v35 }
 0x44c   :  { %2014 = vmatprep.subr.mxu1 %v2409_v41 }
 0x44d   :  { %2015 = vmatpush3.msra.mxu1 %v2409_v41 }
 0x44e   :  { %2017 = vmatmul.mubr.msk.f32.vlgmr.msra.gmra.mxu1 %vm719_vm5, %v2309_v49  ;;  %2030 = vmatprep.subr.mxu1 %v1815_v42 }
 0x44f   :  { %2031 = vmatpush3.msra.mxu1 %v1815_v42  ;;  %2038 = vmatprep.mubr.msk.f32.mxu1 %vm176_vm4, %v250_v21  ;;  %v1022_v21 = vsel %vm176_vm4, %v2409_v41, 0.0  ;;  %v1017_v42 = vrot.slane %v2468_v38, %v83_v53  ;;  %v1832_v53 = vld [vmem:[%s2629_s8 + $0x98] sm:$0xff] }
 0x450   :  { %2032 = vmatprep.subr.mxu1 %v1814_v43 }
 0x451   :  { %2033 = vmatpush3.msra.mxu1 %v1814_v43 }
 0x452   :  { %2034 = vmatprep.subr.mxu1 %v1813_v44 }
 0x453   :  { %2035 = vmatpush3.msra.mxu1 %v1813_v44 }
 0x454   :  { %2036 = vmatprep.subr.mxu1 %v1812_v45 }
 0x455   :  { %2037 = vmatpush3.msra.mxu1 %v1812_v45 }
 0x456   :  { %2039 = vmatmul.mubr.msk.f32.vlgmr.msra.gmra.mxu1 %vm176_vm4, %v255_v17  ;;  %2048 = vmatprep.subr.mxu1 %v2169_v23 }
 0x457   :  { %2056 = vmatprep.mubr.msk.f32.mxu1 %vm2170_vm3, %v2169_v23 }
 0x50e   :  { %v2018_v56 = vpop.f32.mrf.mxu1 }
 0x50f   :  { %v812_v60 = vmul.f32 %v2018_v56, %v2444_v58 }
 0x510   :  { %v792_v57 = vpop.f32.mrf.mxu1 }
 0x511   :  { %v811_v59 = vmul.f32 %v2442_v51, %v792_v57 }
 0x513   :  { %2027 = vmatprep.mubr.msk.f32.mxu0 %vm176_vm4, %v811_v59  ;;  %v1831_v59 = vld [vmem:[%s2629_s8 + $0x90] sm:$0xff] }
 0x514   :  { %2028 = vmatmul.mubr.msk.f32.vlgmr.msra.gmra.mxu0 %vm176_vm4, %v812_v60  ;;  %v1829_v60 = vld [vmem:[%s2629_s8 + $0x80] sm:$0xff] }
 0x515   :  { %2045 = vmatprep.mubr.msk.f32.mxu0 %vm2170_vm3, %v2169_v23 }
 0x516   :  { %v2040_v62 = vpop.f32.mrf.mxu1 }
 0x518   :  { %v966_v2 = vpop.f32.mrf.mxu1 }
 0x5d4   :  { %v2029_v0 = vpop.f32.mrf.mxu0 }
 0x5d5   :  { %v972_v1 = vadd.f32 %v2040_v62, %v2029_v0  ;;  %v1836_v62 = vld [vmem:[%s2629_s8 + $0xb8] sm:$0xff]  ;;  %v1834_v0 = vld [vmem:[%s2629_s8 + $0xa8] sm:$0xff] }
 0x5d6   :  { %v885_v3 = vpop.f32.mrf.mxu0  ;;  %2049 = vmatpush3.msra.mxu1 %v1836_v62 }
 0x5d7   :  { %v967_v4 = vadd.f32 %v966_v2, %v885_v3  ;;  %v980_v5 = vadd.f32 %v978_v63, %v972_v1  ;;  %2050 = vmatprep.subr.mxu1 %v2169_v23  ;;  %v1833_v1 = vld [vmem:[%s2629_s8 + $0xa0] sm:$0xff] }
 0x5d9   :  { %v984_v6 = vsel %vm176_vm4, %v980_v5, 0.0  ;;  %v979_v7 = vadd.f32 %v978_v63, %v967_v4  ;;  %v1835_v63 = vld [vmem:[%s2629_s8 + $0xb0] sm:$0xff] }
 0x5da   :  { %985 = vadd.xlane.f32.xlu1 %v984_v6  ;;  %2051 = vmatpush3.msra.mxu1 %v1835_v63 }
 0x5db   :  { %v981_v8 = vsel %vm176_vm4, %v979_v7, 0.0  ;;  %2052 = vmatprep.subr.mxu1 %v2169_v23 }
 0x5dc   :  { %982 = vadd.xlane.f32.xlu0 %v981_v8  ;;  %2053 = vmatpush3.msra.mxu1 %v1834_v0 }
 0x5dd   :  { %2054 = vmatprep.subr.mxu1 %v2169_v23 }
 0x5de   :  { %2055 = vmatpush3.msra.mxu1 %v1833_v1 }
 0x663   :  { %v986_v9 = vpop.xlane.xlu1 %985 }
 0x664   :  { %v989_v10 = vmul.f32 0.03125, %v986_v9 }
 0x665   :  { %v983_v11 = vpop.xlane.xlu0 %982 }
 0x666   :  { %v991_v14 = vsub.f32 %v980_v5, %v989_v10  ;;  %v988_v15 = vmul.f32 0.03125, %v983_v11  ;;  %v1038_v5 = vrot.slane %v2468_v38, %v174_v12  ;;  %v1844_v12 = vld [vmem:[%s2629_s8 + $0xf8] sm:$0xff] }
 0x668   :  { %v990_v16 = vsub.f32 %v979_v7, %v988_v15  ;;  %v993_v17 = vmul.f32 %v991_v14, %v991_v14  ;;  %v1043_v7 = vrot.slane %v2468_v38, %v278_v55 }
 0x66a   :  { %v997_v18 = vsel %vm176_vm4, %v993_v17, 0.0  ;;  %v992_v19 = vmul.f32 %v990_v16, %v990_v16  ;;  %v1284_v17 = vrot.slane %v2468_v38, %v365_v13  ;;  %v1838_v13 = vld [vmem:[%s2629_s8 + $0xc8] sm:$0xff] }
 0x66b   :  { %998 = vadd.xlane.f32.xlu1 %v997_v18 }
 0x66c   :  { %v994_v20 = vsel %vm176_vm4, %v992_v19, 0.0 }
 0x66f   :  { %995 = vadd.xlane.f32.xlu1 %v994_v20 }
 0x673   :  { %1023 = vadd.xlane.f32.xlu1 %v1022_v21  ;;  %v1839_v21 = vld [vmem:[%s2629_s8 + $0xd0] sm:$0xff] }
 0x6f4   :  { %v999_v24 = vpop.xlane.xlu1 %998 }
 0x6f5   :  { %v1001_v25 = vmul.f32 0.03125, %v999_v24  ;;  %v1837_v24 = vld [vmem:[%s2629_s8 + $0xc0] sm:$0xff] }
 0x6f7   :  { %v1003_v26 = vadd.f32 1e-05, %v1001_v25  ;;  %v1842_v25 = vld [vmem:[%s2629_s8 + $0xe8] sm:$0xff] }
 0x6f8   :  { %v996_v27 = vpop.xlane.xlu1 %995 }
 0x6f9   :  { %2133 = vrsqrt.f32 %v1003_v26  ;;  %v1000_v28 = vmul.f32 0.03125, %v996_v27  ;;  %v1841_v26 = vld [vmem:[%s2629_s8 + $0xe0] sm:$0xff] }
 0x6fb   :  { %v1002_v29 = vadd.f32 1e-05, %v1000_v28 }
 0x6fc   :  { %v1024_v31 = vpop.xlane.xlu1 %1023 }
 0x6fd   :  { %2135 = vrsqrt.f32 %v1002_v29  ;;  %v1025_v32 = vmul.f32 0.03125, %v1024_v31 }
 0x6ff   :  { %v1026_v33 = vsub.f32 %v2409_v41, %v1025_v32 }
 0x701   :  { %v1027_v34 = vmul.f32 %v1026_v33, %v1026_v33 }
 0x703   :  { %v1028_v37 = vsel %vm176_vm4, %v1027_v34, 0.0 }
 0x704   :  { %1029 = vadd.xlane.f32.xlu1 %v1028_v37 }
 0x706   :  { %v2134_v40 = vpop.eup %2133 }
 0x707   :  { %v1007_v43 = vmul.f32 %v2134_v40, %v991_v14 }
 0x709   :  { %v1013_v41 = vmul.f32 %v1011_v39, %v1007_v43 }
 0x70a   :  { %v2136_v44 = vpop.eup %2135 }
 0x70b   :  { %v2474_v45 = vadd.f32 %v1017_v42, %v1013_v41  ;;  %v1006_v46 = vmul.f32 %v2136_v44, %v990_v16 }
 0x70d   :  { %v1021_v48 = vmax.f32 %v2474_v45, 0.0  ;;  %v1012_v50 = vmul.f32 %v1011_v39, %v1006_v46 }
 0x70f   :  { %2042 = vmatpush3.msra.mxu0 %v1021_v48  ;;  %v2479_v56 = vadd.f32 %v1017_v42, %v1012_v50 }
 0x710   :  { %2043 = vmatprep.subr.mxu0 %v2169_v23 }
 0x711   :  { %v1020_v57 = vmax.f32 %v2479_v56, 0.0 }
 0x713   :  { %2044 = vmatpush3.msra.mxu0 %v1020_v57 }
 0x714   :  { %2046 = vmatmul.mubr.msk.f32.vlgmr.msra.gmra.mxu0 %vm51_vm0, %v2372_v22  ;;  %2059 = vmatprep.subr.mxu0 %v2169_v23  ;;  %v1830_v22 = vld [vmem:[%s2629_s8 + $0x88] sm:$0xff] }
 0x715   :  { %2067 = vmatprep.mubr.msk.f32.mxu0 %vm2170_vm3, %v2169_v23  ;;  %2060 = vmatpush3.msra.mxu0 %v1832_v53 }
 0x716   :  { %2061 = vmatprep.subr.mxu0 %v2169_v23 }
 0x717   :  { %2062 = vmatpush3.msra.mxu0 %v1831_v59 }
 0x718   :  { %2063 = vmatprep.subr.mxu0 %v2169_v23 }
 0x719   :  { %2064 = vmatpush3.msra.mxu0 %v1830_v22 }
 0x71a   :  { %2065 = vmatprep.subr.mxu0 %v2169_v23 }
 0x71b   :  { %2066 = vmatpush3.msra.mxu0 %v1829_v60 }
 0x71c   :  { %2075 = vmatprep.subr.mxu0 %v1844_v12 }
 0x78d   :  { %v1030_v2 = vpop.xlane.xlu1 %1029 }
 0x78e   :  { %v1031_v3 = vmul.f32 0.03125, %v1030_v2 }
 0x790   :  { %v1032_v4 = vadd.f32 1e-05, %v1031_v3  ;;  %v1560_v3 = vrot.slane %v2468_v38, %v716_v36 }
 0x792   :  { %2137 = vrsqrt.f32 %v1032_v4 }
 0x79f   :  { %v2138_v6 = vpop.eup %2137 }
 0x7a0   :  { %v1034_v8 = vmul.f32 %v2138_v6, %v1026_v33  ;;  %v1527_v33 = vsub.s32 4, %v2318_v52  ;;  %v1566_v6 = vrot.slane %v2468_v38, %v977_v61 }
 0x7a2   :  { %v1039_v23 = vmul.f32 %v1038_v5, %v1034_v8  ;;  %v1528_v42 = vrot.slane %v2468_v38, %v1527_v33 }
 0x7a4   :  { %v1044_v9 = vadd.f32 %v1043_v7, %v1039_v23 }
 0x7a6   :  { %v1045_v10 = vmax.f32 %v1044_v9, 0.0 }
 0x7a8   :  { %2068 = vmatmul.mubr.msk.f32.vlgmr.msra.gmra.mxu0 %vm176_vm4, %v1045_v10 }
 0x7a9   :  { %2076 = vmatpush3.msra.mxu0 %v1844_v12 }
 0x7d4   :  { %v1130_v11 = vpop.f32.mrf.mxu0 }
 0x7d5   :  { %v1134_v14 = vmul.f32 %v1130_v11, %v2396_v30 }
 0x7d6   :  { %v2047_v15 = vpop.f32.mrf.mxu0 }
 0x7d7   :  { %2057 = vmatmul.mubr.msk.f32.vlgmr.msra.gmra.mxu1 %vm176_vm4, %v1134_v14 }
 0x7d8   :  { %2072 = vmatprep.mubr.msk.f32.mxu1 %vm719_vm5, %v2299_v47  ;;  %v1840_v47 = vld [vmem:[%s2629_s8 + $0xd8] sm:$0xff] }
 0x868   :  { %v1277_v55 = vpop.f32.mrf.mxu0 }
 0x86a   :  { %v2069_v16 = vpop.f32.mrf.mxu0 }
 0x897   :  { %v1204_v18 = vpop.f32.mrf.mxu1 }
 0x898   :  { %v1278_v30 = vadd.f32 %v1277_v55, %v1204_v18 }
 0x899   :  { %v2058_v19 = vpop.f32.mrf.mxu1 }
 0x89a   :  { %v1285_v20 = vadd.f32 %v1284_v17, %v1278_v30 }
 0x89c   :  { %2070 = vmatprep.subr.mxu1 %v1285_v20 }
 0x89d   :  { %2071 = vmatpush3.msra.mxu1 %v1285_v20 }
 0x89e   :  { %2073 = vmatmul.mubr.msk.f32.vlgmr.msra.gmra.mxu1 %vm719_vm5, %v2309_v49  ;;  %2086 = vmatprep.subr.mxu1 %v1840_v47  ;;  %v1843_v49 = vld [vmem:[%s2629_s8 + $0xf0] sm:$0xff] }
 0x89f   :  { %2087 = vmatpush3.msra.mxu1 %v1840_v47  ;;  %2094 = vmatprep.mubr.msk.f32.mxu1 %vm176_vm4, %v1020_v57 }
 0x8a0   :  { %2088 = vmatprep.subr.mxu1 %v1839_v21  ;;  %2077 = vmatprep.subr.mxu0 %v1843_v49 }
 0x8a1   :  { %2089 = vmatpush3.msra.mxu1 %v1839_v21  ;;  %2078 = vmatpush3.msra.mxu0 %v1843_v49  ;;  %v1856_v49 = vld [vmem:[%s2628_s7 + $0x50] sm:$0xff] }
 0x8a2   :  { %2090 = vmatprep.subr.mxu1 %v1838_v13  ;;  %2079 = vmatprep.subr.mxu0 %v1842_v25 }
 0x8a3   :  { %2091 = vmatpush3.msra.mxu1 %v1838_v13  ;;  %2080 = vmatpush3.msra.mxu0 %v1842_v25  ;;  %v1855_v25 = vld [vmem:[%s2628_s7 + $0x48] sm:$0xff] }
 0x8a4   :  { %2092 = vmatprep.subr.mxu1 %v1837_v24  ;;  %2081 = vmatprep.subr.mxu0 %v1841_v26 }
 0x8a5   :  { %2093 = vmatpush3.msra.mxu1 %v1837_v24  ;;  %2082 = vmatpush3.msra.mxu0 %v1841_v26  ;;  %v1857_v24 = vld [vmem:[%s2628_s7 + $0x58] sm:$0xff]  ;;  %v1854_v26 = vld [vmem:[%s2628_s7 + $0x40] sm:$0xff] }
 0x8a6   :  { %2095 = vmatmul.mubr.msk.f32.vlgmr.msra.gmra.mxu1 %vm176_vm4, %v1021_v48  ;;  %2097 = vmatprep.subr.mxu0 %v1857_v24 }
 0x95e   :  { %v2074_v27 = vpop.f32.mrf.mxu1 }
 0x95f   :  { %v1362_v31 = vmul.f32 %v2074_v27, %v2444_v58 }
 0x960   :  { %v1352_v28 = vpop.f32.mrf.mxu1 }
 0x961   :  { %v1361_v29 = vmul.f32 %v1352_v28, %v2442_v51 }
 0x963   :  { %2083 = vmatprep.mubr.msk.f32.mxu0 %vm176_vm4, %v1361_v29 }
 0x964   :  { %2084 = vmatmul.mubr.msk.f32.vlgmr.msra.gmra.mxu0 %vm176_vm4, %v1362_v31 }
 0x965   :  { %2098 = vmatpush3.msra.mxu0 %v1857_v24 }
 0x966   :  { %v2096_v32 = vpop.f32.mrf.mxu1  ;;  %2099 = vmatprep.subr.mxu0 %v1856_v49 }
 0x967   :  { %2100 = vmatpush3.msra.mxu0 %v1856_v49 }
 0x968   :  { %v1516_v35 = vpop.f32.mrf.mxu1  ;;  %2101 = vmatprep.subr.mxu0 %v1855_v25 }
 0x969   :  { %2102 = vmatpush3.msra.mxu0 %v1855_v25 }
 0x96a   :  { %2103 = vmatprep.subr.mxu0 %v1854_v26 }
 0x96b   :  { %2104 = vmatpush3.msra.mxu0 %v1854_v26 }
 0xa24   :  { %v2085_v34 = vpop.f32.mrf.mxu0 }
 0xa25   :  { %v1522_v39 = vadd.f32 %v2096_v32, %v2085_v34 }
 0xa26   :  { %v1435_v37 = vpop.f32.mrf.mxu0 }
 0xa27   :  { %v1517_v40 = vadd.f32 %v1516_v35, %v1435_v37  ;;  %v1530_v58 = vadd.f32 %v1528_v42, %v1522_v39 }
 0xa29   :  { %v1529_v43 = vadd.f32 %v1528_v42, %v1517_v40  ;;  %v1534_v41 = vsel %vm176_vm4, %v1530_v58, 0.0  ;;  %v1694_v42 = vld [vmem:[%s2631_s10 + $0x18] sm:$0xff] }
 0xa2a   :  { %2108 = vmatprep.subr.mxu1 %v1694_v42 }
 0xa2b   :  { %v1531_v51 = vsel %vm176_vm4, %v1529_v43, 0.0  ;;  %2109 = vmatpush3.msra.mxu1 %v1694_v42 }
 0xa2c   :  { %1532 = vadd.xlane.f32.xlu1 %v1531_v51  ;;  %v1692_v51 = vld [vmem:[%s2631_s10 + $0x8] sm:$0xff] }
 0xa30   :  { %1535 = vadd.xlane.f32.xlu1 %v1534_v41  ;;  %v1607_v41 = vrot.slane %v2324_v54, %v1527_v33 }
 0xab5   :  { %v1533_v44 = vpop.xlane.xlu1 %1532 }
 0xab6   :  { %v1537_v45 = vmul.f32 0.03125, %v1533_v44 }
 0xab8   :  { %v1539_v46 = vsub.f32 %v1529_v43, %v1537_v45  ;;  %v1693_v43 = vld [vmem:[%s2631_s10 + $0x10] sm:$0xff] }
 0xab9   :  { %v1536_v48 = vpop.xlane.xlu1 %1535  ;;  %2110 = vmatprep.subr.mxu1 %v1693_v43 }
 0xaba   :  { %v1538_v50 = vmul.f32 0.03125, %v1536_v48  ;;  %v1541_v56 = vmul.f32 %v1539_v46, %v1539_v46  ;;  %2111 = vmatpush3.msra.mxu1 %v1693_v43 }
 0xabb   :  { %2112 = vmatprep.subr.mxu1 %v1692_v51 }
 0xabc   :  { %v1540_v57 = vsub.f32 %v1530_v58, %v1538_v50  ;;  %v1543_v53 = vsel %vm176_vm4, %v1541_v56, 0.0  ;;  %2113 = vmatpush3.msra.mxu1 %v1692_v51  ;;  %v1691_v58 = vld [vmem:[%s2631_s10] sm:$0xff]  ;;  %s2172_s10 = smov [#allocation2]  }
 0xabd   :  { %1544 = vadd.xlane.f32.xlu1 %v1543_v53  ;;  %2114 = vmatprep.subr.mxu1 %v1691_v58  ;;  %s1790_s23 = sshll.u32 %s2172_s10, 4  ;;  %s1791_s23 = int_to_ptr.vmem [resolvable:$true] %s1790_s23 }
 0xabe   :  { %v1542_v59 = vmul.f32 %v1540_v57, %v1540_v57  ;;  %2115 = vmatpush3.msra.mxu1 %v1691_v58  ;;  %s2147_s3 = scalar_lea.vmem %s1791_s23, 256  ;;  %p2152_p1 = scmp.lt.s32.totalorder %s1791_s23, %s1791_s23 }
 0xabf   :  { %p2148_p0 = scmp.ne.s32.totalorder %s1791_s23, %s2147_s3  ;;  %p2153_p2 = scmp.lt.s32.totalorder %s2147_s3, %s2147_s3 }
 0xac0   :  { %v1546_v22 = vsel %vm176_vm4, %v1542_v59, 0.0 }
 0xac1   :  { %1547 = vadd.xlane.f32.xlu1 %v1546_v22  ;;  %p2154_p3 = por %p2153_p2, %p2152_p1 }
 0xac3   :  { %p2155_p4 = pnand %p2154_p3, %p2148_p0 }
 0xb46   :  { %v1545_v60 = vpop.xlane.xlu1 %1544 }
 0xb47   :  { %v1549_v62 = vmul.f32 0.03125, %v1545_v60 }
 0xb49   :  { %v1551_v63 = vadd.f32 1e-05, %v1549_v62 }
 0xb4a   :  { %v1548_v0 = vpop.xlane.xlu1 %1547 }
 0xb4b   :  { %2139 = vrsqrt.f32 %v1551_v63  ;;  %v1550_v1 = vmul.f32 0.03125, %v1548_v0 }
 0xb4d   :  { %v1552_v2 = vadd.f32 1e-05, %v1550_v1 }
 0xb4f   :  { %2141 = vrsqrt.f32 %v1552_v2 }
 0xb58   :  { %v2140_v4 = vpop.eup %2139 }
 0xb59   :  { %v1555_v5 = vmul.f32 %v2140_v4, %v1539_v46 }
 0xb5b   :  { %v1561_v7 = vmul.f32 %v1560_v3, %v1555_v5 }
 0xb5c   :  { %v2142_v8 = vpop.eup %2141 }
 0xb5d   :  { %v1567_v23 = vadd.f32 %v1566_v6, %v1561_v7  ;;  %v1556_v9 = vmul.f32 %v2142_v8, %v1540_v57  ;;  %v1860_v57 = vld [vmem:[%s2632_s11] ss:$0 sm:$0xff] }
 0xb5f   :  { %v1569_v10 = vmax.f32 %v1567_v23, 0.0  ;;  %v1562_v11 = vmul.f32 %v1560_v3, %v1556_v9 }
 0xb61   :  { %v1571_v14 = vmax.f32 %v1569_v10, 0.0  ;;  %v1568_v15 = vadd.f32 %v1566_v6, %v1562_v11 }
 0xb63   :  { %v1573_v12 = vsel %vm176_vm4, %v1571_v14, 0.0  ;;  %v1570_v55 = vmax.f32 %v1568_v15, 0.0 }
 0xb64   :  { %1574 = vadd.xlane.f32.xlu1 %v1573_v12 }
 0xb65   :  { %v1572_v16 = vmax.f32 %v1570_v55, 0.0 }
 0xb67   :  { %v1576_v36 = vsel %vm176_vm4, %v1572_v16, 0.0 }
 0xb68   :  { %1577 = vadd.xlane.f32.xlu0 %v1576_v36 }
 0xbed   :  { %v1575_v17 = vpop.xlane.xlu1 %1574 }
 0xbee   :  { %v1579_v18 = vmul.f32 0.03125, %v1575_v17 }
 0xbf0   :  { %v1581_v30 = vsub.f32 %v1571_v14, %v1579_v18 }
 0xbf1   :  { %v1578_v61 = vpop.xlane.xlu0 %1577 }
 0xbf2   :  { %v1580_v38 = vmul.f32 0.03125, %v1578_v61  ;;  %v1583_v19 = vmul.f32 %v1581_v30, %v1581_v30 }
 0xbf4   :  { %v1582_v20 = vsub.f32 %v1572_v16, %v1580_v38  ;;  %v1585_v47 = vsel %vm176_vm4, %v1583_v19, 0.0 }
 0xbf5   :  { %1586 = vadd.xlane.f32.xlu1 %v1585_v47 }
 0xbf6   :  { %v1584_v21 = vmul.f32 %v1582_v20, %v1582_v20 }
 0xbf8   :  { %v1588_v13 = vsel %vm176_vm4, %v1584_v21, 0.0 }
 0xbf9   :  { %1589 = vadd.xlane.f32.xlu0 %v1588_v13 }
 0xc7e   :  { %v1587_v27 = vpop.xlane.xlu1 %1586 }
 0xc7f   :  { %v1591_v28 = vmul.f32 0.03125, %v1587_v27 }
 0xc81   :  { %v1593_v29 = vadd.f32 1e-05, %v1591_v28 }
 0xc82   :  { %v1590_v31 = vpop.xlane.xlu0 %1589 }
 0xc83   :  { %2143 = vrsqrt.f32 %v1593_v29  ;;  %v1592_v32 = vmul.f32 0.03125, %v1590_v31 }
 0xc85   :  { %v1594_v34 = vadd.f32 1e-05, %v1592_v32 }
 0xc87   :  { %2145 = vrsqrt.f32 %v1594_v34 }
 0xc90   :  { %v2144_v35 = vpop.eup %2143 }
 0xc91   :  { %v1597_v37 = vmul.f32 %v2144_v35, %v1581_v30 }
 0xc93   :  { %2105 = vmatprep.mubr.msk.f32.mxu0 %vm176_vm4, %v1597_v37 }
 0xc94   :  { %v2146_v39 = vpop.eup %2145 }
 0xc95   :  { %v1598_v40 = vmul.f32 %v2146_v39, %v1582_v20 }
 0xc97   :  { %2106 = vmatmul.mubr.msk.f32.vlgmr.msra.gmra.mxu0 %vm176_vm4, %v1598_v40 }
 0xd57   :  { %v2107_v44 = vpop.f32.mrf.mxu0 }
 0xd58   :  { %v1686_v45 = vadd.f32 %v2107_v44, %v1607_v41 }
 0xd59   :  { %v1680_v46 = vpop.f32.mrf.mxu0 }
 0xd5a   :  { %v1681_v48 = vadd.f32 %v1680_v46, %v1607_v41  ;;  %v1690_v56 = vmax.f32 %v1686_v45, 0.0 }
 0xd5c   :  { %v1689_v50 = vmax.f32 %v1681_v48, 0.0 }
 0xd5e   :  { %2116 = vmatprep.mubr.msk.f32.mxu1 %vm176_vm4, %v1689_v50 }
 0xd5f   :  { %2117 = vmatmul.mubr.msk.f32.vlgmr.msra.gmra.mxu1 %vm176_vm4, %v1690_v56 }
 0xe1f   :  { %v2118_v53 = vpop.f32.mrf.mxu1 }
 0xe20   :  { %v1780_v52 = vadd.f32 %v2118_v53, %v1860_v57 }
 0xe21   :  { %v1774_v59 = vpop.f32.mrf.mxu1 }
 0xe22   :  { %1784 = vst [vmem:[#allocation2 + $0x8] sm:$0xff] %v1780_v52  ;;  %v1775_v54 = vadd.f32 %v1860_v57, %v1774_v59 }
 0xe24   :  { %1783 = vst [vmem:[#allocation2] sm:$0xff] %v1775_v54 }
 0xe25   :  { %2158 = shalt.err (!%p2155_p4)
}
 0xe26   :  { %s2173_s24 = smov 128   ;;  %s2174_s4 = smov 8  }
 0xe27   :  { %1796 = dma.vmem_to_hbm [thread:$0]  %s1791_s23, 256, %s2633_s12, [#allocation3], %s2173_s24, %s2173_s24, %s2174_s4  }
 0xe28   :  { %2167 = dma.done.wait [#allocation3], 256  }
 0xe29   :  { %2168 = vsyncadd [#allocation3], 4294967040 }
 0xe2a   :  { %1800 = vsyncpa [#allocation3], 1 }

</bundles_post_ra>
